<compile_context>
chip_gen: v6e
topology: v6e:2x2x1
jax: 0.10.0
libtpu: 0.0.40
codegen_flags: <defaults>
</compile_context>

<pallas_src>
import math

import jax
import jax.numpy as jnp
from jax.experimental import pallas as pl
from jax.experimental.pallas import tpu as pltpu

# Small synthetic config (the real encoder's config comes from a checkpoint).
B = 2          # batch (number of SMILES strings per input list)
S = 8          # padded token sequence length
H = 32         # hidden size
F = 64         # FFN intermediate size
VOCAB = 40     # tokenizer vocab size
N_LAYERS = 2   # transformer layers
LN_EPS = 1e-12

GB = 3 * B     # fused batch: pos_a ++ pos_b ++ neg
GRID = 2       # 2 "parallel" grid steps -> shards across both v7x TensorCores
GBLK = GB // GRID

# Packed small-vector layout: one (N_LAYERS, NV, VW) array holds every
# bias / LayerNorm vector of every layer (row index -> which vector).
IDX_BQ, IDX_BK, IDX_BV, IDX_BO = 0, 1, 2, 3
IDX_G1, IDX_BE1 = 4, 5
IDX_B1, IDX_B2 = 6, 7
IDX_G2, IDX_BE2 = 8, 9
NV = 10
VW = 128       # lane-dense pack width


# --------------------------------------------------------------------------
# Pallas kernel: full N_LAYERS encoder stack over a (GBLK, S, H) batch slab.
# --------------------------------------------------------------------------
def _encoder_kernel(x_ref, wattn_ref, w1_ref, w2_ref, vec_ref, o_ref):
    g, s, h = x_ref.shape                     # (GBLK, S, H), all static
    x = x_ref[...]                            # (g, s, h) f32

    def _ln(t, gamma, beta):
        mu = jnp.mean(t, axis=-1, keepdims=True)
        var = jnp.mean(jnp.square(t - mu), axis=-1, keepdims=True)
        return (t - mu) * jax.lax.rsqrt(var + LN_EPS) * gamma + beta

    # N_LAYERS is tiny (2): unrolled Python loop, weights indexed statically.
    for l in range(N_LAYERS):
        wq = wattn_ref[l, 0]                  # (H, H)
        wk = wattn_ref[l, 1]
        wv = wattn_ref[l, 2]
        wo = wattn_ref[l, 3]
        w1 = w1_ref[l]                        # (H, F)
        w2 = w2_ref[l]                        # (F, H)

        bq = vec_ref[l, IDX_BQ:IDX_BQ + 1, :H]    # (1, H)
        bk = vec_ref[l, IDX_BK:IDX_BK + 1, :H]
        bv = vec_ref[l, IDX_BV:IDX_BV + 1, :H]
        bo = vec_ref[l, IDX_BO:IDX_BO + 1, :H]
        g1 = vec_ref[l, IDX_G1:IDX_G1 + 1, :H]
        be1 = vec_ref[l, IDX_BE1:IDX_BE1 + 1, :H]
        b1 = vec_ref[l, IDX_B1:IDX_B1 + 1, :F]    # (1, F)
        b2 = vec_ref[l, IDX_B2:IDX_B2 + 1, :H]
        g2 = vec_ref[l, IDX_G2:IDX_G2 + 1, :H]
        be2 = vec_ref[l, IDX_BE2:IDX_BE2 + 1, :H]

        # ---- pre-LN self-attention (single head, head_dim == H) ----
        # TODO(synk): no attention/padding mask (the real tokenizer's padding
        # mask would be added to `scores` before the softmax).
        xn = _ln(x, g1, be1)                      # (g, s, h)
        xn2d = xn.reshape(g * s, h)               # minor dim untouched -> cheap

        q = (jnp.dot(xn2d, wq, preferred_element_type=jnp.float32) + bq).reshape(g, s, h)
        k = (jnp.dot(xn2d, wk, preferred_element_type=jnp.float32) + bk).reshape(g, s, h)
        v = (jnp.dot(xn2d, wv, preferred_element_type=jnp.float32) + bv).reshape(g, s, h)

        # Batched QK^T via dot_general (no explicit XLU transpose of k).
        scores = jnp.einsum("bqd,bkd->bqk", q, k,
                            preferred_element_type=jnp.float32) * (1.0 / math.sqrt(H))
        scores = scores - jnp.max(scores, axis=-1, keepdims=True)
        p = jnp.exp(scores)
        p = p * pl.reciprocal(jnp.sum(p, axis=-1, keepdims=True), approx=True)

        attn = jnp.einsum("bqk,bkd->bqd", p, v,
                          preferred_element_type=jnp.float32)          # (g, s, h)
        attn = jnp.dot(attn.reshape(g * s, h), wo,
                       preferred_element_type=jnp.float32) + bo
        x = x + attn.reshape(g, s, h)

        # ---- pre-LN feed-forward ----
        xn2 = _ln(x, g2, be2).reshape(g * s, h)
        hid = jnp.dot(xn2, w1, preferred_element_type=jnp.float32) + b1   # (g*s, F)
        hid = jax.nn.gelu(hid, approximate=True)
        ff = jnp.dot(hid, w2, preferred_element_type=jnp.float32) + b2
        x = x + ff.reshape(g, s, h)

    o_ref[...] = x


def _full_spec(shape):
    # Whole weight array resident in VMEM for every grid step.
    nd = len(shape)
    return pl.BlockSpec(shape, lambda g, _nd=nd: (0,) * _nd)


def encoder_forward(x, params):
    """Full encoder stack.  x: (3B, S, H) f32 -> (3B, S, H) f32."""
    act_spec = pl.BlockSpec((GBLK, S, H), lambda g: (g, 0, 0))
    return pl.pallas_call(
        _encoder_kernel,
        out_shape=jax.ShapeDtypeStruct((GB, S, H), jnp.float32),
        grid_spec=pltpu.PrefetchScalarGridSpec(
            num_scalar_prefetch=0,
            grid=(GRID,),
            in_specs=[
                act_spec,
                _full_spec((N_LAYERS, 4, H, H)),   # wq/wk/wv/wo stacked
                _full_spec((N_LAYERS, H, F)),      # FFN in
                _full_spec((N_LAYERS, F, H)),      # FFN out
                _full_spec((N_LAYERS, NV, VW)),    # packed biases / LN vectors
            ],
            out_specs=act_spec,
        ),
        compiler_params=pltpu.CompilerParams(
            dimension_semantics=("parallel",)),
    )(x, params["w_attn"], params["w1"], params["w2"], params["vec"])


# --------------------------------------------------------------------------
# Parameter init (deterministic, stands in for the pretrained checkpoint).
# Per-layer weights are stacked along a leading layer axis so the whole stack
# is a single pallas_call operand.
# --------------------------------------------------------------------------
def init_params(key):
    keys = jax.random.split(key, 2 + N_LAYERS)
    tok_emb = 0.02 * jax.random.normal(keys[0], (VOCAB, H), jnp.float32)
    pos_emb = 0.02 * jax.random.normal(keys[1], (S, H), jnp.float32)

    w_attn, w1, w2, vec = [], [], [], []
    for i in range(N_LAYERS):
        lk = jax.random.split(keys[2 + i], 6)
        wq = 0.02 * jax.random.normal(lk[0], (H, H), jnp.float32)
        wk = 0.02 * jax.random.normal(lk[1], (H, H), jnp.float32)
        wv = 0.02 * jax.random.normal(lk[2], (H, H), jnp.float32)
        wo = 0.02 * jax.random.normal(lk[3], (H, H), jnp.float32)
        w_attn.append(jnp.stack([wq, wk, wv, wo]))                 # (4, H, H)
        w1.append(0.02 * jax.random.normal(lk[4], (H, F), jnp.float32))
        w2.append(0.02 * jax.random.normal(lk[5], (F, H), jnp.float32))

        v = jnp.zeros((NV, VW), jnp.float32)                       # biases/betas = 0
        v = v.at[IDX_G1, :H].set(1.0)                              # LN1 gamma = 1
        v = v.at[IDX_G2, :H].set(1.0)                              # LN2 gamma = 1
        vec.append(v)

    return {
        "tok_emb": tok_emb,
        "pos_emb": pos_emb,
        "w_attn": jnp.stack(w_attn),   # (L, 4, H, H)
        "w1": jnp.stack(w1),           # (L, H, F)
        "w2": jnp.stack(w2),           # (L, F, H)
        "vec": jnp.stack(vec),         # (L, NV, 128)
    }


# --------------------------------------------------------------------------
# Forward: mirror of SmilesEncoder.forward — same encoder applied to three
# token-id batches, fused into one encoder pass and split at the end.
# --------------------------------------------------------------------------
@jax.jit
def smiles_encoder_forward(pos_smilesa_ids, pos_smilesb_ids, neg_smiles_ids, params):
    ids = jnp.concatenate([pos_smilesa_ids, pos_smilesb_ids, neg_smiles_ids], axis=0)  # (3B, S)
    # Embedding lookup is glue (gather); the transformer stack is one Pallas call.
    x = jnp.take(params["tok_emb"], ids, axis=0) + params["pos_emb"][None, :, :]
    out = encoder_forward(x.astype(jnp.float32), params)                               # (3B, S, H)
    return out[:B], out[B:2 * B], out[2 * B:]


if __name__ == "__main__":
    # TODO(synk): AutoTokenizer string tokenization has no Pallas/JAX
    # equivalent; deterministic token ids are generated directly instead.
    key = jax.random.PRNGKey(0)
    k1, k2, k3 = jax.random.split(key, 3)
    pos_a_ids = jax.random.randint(k1, (B, S), 0, VOCAB, dtype=jnp.int32)
    pos_b_ids = jax.random.randint(k2, (B, S), 0, VOCAB, dtype=jnp.int32)
    neg_ids = jax.random.randint(k3, (B, S), 0, VOCAB, dtype=jnp.int32)

    params = init_params(jax.random.PRNGKey(42))

    fa, fb, fn = smiles_encoder_forward(pos_a_ids, pos_b_ids, neg_ids, params)
    jax.block_until_ready((fa, fb, fn))

    assert fa.shape == (B, S, H) and fb.shape == (B, S, H) and fn.shape == (B, S, H)
    assert jnp.all(jnp.isfinite(fa)) and jnp.all(jnp.isfinite(fb)) and jnp.all(jnp.isfinite(fn))
    print("KERNEL_OK")
</pallas_src>

<mosaic_0001>
module attributes {stable_mosaic.version = 11 : i64} {
  func.func @_encoder_kernel(%arg0: i32, %arg1: memref<3x8x32xf32, #tpu.memory_space<vmem>>, %arg2: memref<2x4x32x32xf32, #tpu.memory_space<vmem>>, %arg3: memref<2x32x64xf32, #tpu.memory_space<vmem>>, %arg4: memref<2x64x32xf32, #tpu.memory_space<vmem>>, %arg5: memref<2x10x128xf32, #tpu.memory_space<vmem>>, %arg6: memref<3x8x32xf32, #tpu.memory_space<vmem>>) attributes {dimension_semantics = [#tpu.dimension_semantics<parallel>], iteration_bounds = array<i64: 2>, scalar_prefetch = 0 : i64, scratch_operands = 0 : i64, tpu.core_type = #tpu.core_type<tc>, window_params = [{transform_indices = @transform_0, window_bounds = array<i64: 3, 8, 32>}, {pipeline_mode = #tpu.pipeline_mode<synchronous>, transform_indices = @transform_1, window_bounds = array<i64: 2, 4, 32, 32>}, {pipeline_mode = #tpu.pipeline_mode<synchronous>, transform_indices = @transform_2, window_bounds = array<i64: 2, 32, 64>}, {pipeline_mode = #tpu.pipeline_mode<synchronous>, transform_indices = @transform_3, window_bounds = array<i64: 2, 64, 32>}, {pipeline_mode = #tpu.pipeline_mode<synchronous>, transform_indices = @transform_4, window_bounds = array<i64: 2, 10, 128>}, {transform_indices = @transform_5, window_bounds = array<i64: 3, 8, 32>}]} {
    %c0 = arith.constant 0 : index
    %c0_0 = arith.constant 0 : index
    %c0_1 = arith.constant 0 : index
    %0 = vector.load %arg1[%c0, %c0_0, %c0_1] : memref<3x8x32xf32, #tpu.memory_space<vmem>>, vector<3x8x32xf32>
    %c0_2 = arith.constant 0 : index
    %c0_3 = arith.constant 0 : index
    %c0_4 = arith.constant 0 : index
    %c0_5 = arith.constant 0 : index
    %1 = vector.load %arg2[%c0_2, %c0_3, %c0_4, %c0_5] : memref<2x4x32x32xf32, #tpu.memory_space<vmem>>, vector<1x1x32x32xf32>
    %2 = vector.shape_cast %1 : vector<1x1x32x32xf32> to vector<32x32xf32>
    %c0_6 = arith.constant 0 : index
    %c1 = arith.constant 1 : index
    %c0_7 = arith.constant 0 : index
    %c0_8 = arith.constant 0 : index
    %3 = vector.load %arg2[%c0_6, %c1, %c0_7, %c0_8] : memref<2x4x32x32xf32, #tpu.memory_space<vmem>>, vector<1x1x32x32xf32>
    %4 = vector.shape_cast %3 : vector<1x1x32x32xf32> to vector<32x32xf32>
    %c0_9 = arith.constant 0 : index
    %c2 = arith.constant 2 : index
    %c0_10 = arith.constant 0 : index
    %c0_11 = arith.constant 0 : index
    %5 = vector.load %arg2[%c0_9, %c2, %c0_10, %c0_11] : memref<2x4x32x32xf32, #tpu.memory_space<vmem>>, vector<1x1x32x32xf32>
    %6 = vector.shape_cast %5 : vector<1x1x32x32xf32> to vector<32x32xf32>
    %c0_12 = arith.constant 0 : index
    %c3 = arith.constant 3 : index
    %c0_13 = arith.constant 0 : index
    %c0_14 = arith.constant 0 : index
    %7 = vector.load %arg2[%c0_12, %c3, %c0_13, %c0_14] : memref<2x4x32x32xf32, #tpu.memory_space<vmem>>, vector<1x1x32x32xf32>
    %8 = vector.shape_cast %7 : vector<1x1x32x32xf32> to vector<32x32xf32>
    %c0_15 = arith.constant 0 : index
    %c0_16 = arith.constant 0 : index
    %c0_17 = arith.constant 0 : index
    %9 = vector.load %arg3[%c0_15, %c0_16, %c0_17] : memref<2x32x64xf32, #tpu.memory_space<vmem>>, vector<1x32x64xf32>
    %10 = vector.shape_cast %9 : vector<1x32x64xf32> to vector<32x64xf32>
    %c0_18 = arith.constant 0 : index
    %c0_19 = arith.constant 0 : index
    %c0_20 = arith.constant 0 : index
    %11 = vector.load %arg4[%c0_18, %c0_19, %c0_20] : memref<2x64x32xf32, #tpu.memory_space<vmem>>, vector<1x64x32xf32>
    %12 = vector.shape_cast %11 : vector<1x64x32xf32> to vector<64x32xf32>
    %c0_21 = arith.constant 0 : index
    %c0_22 = arith.constant 0 : index
    %c0_23 = arith.constant 0 : index
    %13 = vector.load %arg5[%c0_21, %c0_22, %c0_23] : memref<2x10x128xf32, #tpu.memory_space<vmem>>, vector<1x1x32xf32>
    %14 = vector.shape_cast %13 : vector<1x1x32xf32> to vector<1x32xf32>
    %c0_24 = arith.constant 0 : index
    %c1_25 = arith.constant 1 : index
    %c0_26 = arith.constant 0 : index
    %15 = vector.load %arg5[%c0_24, %c1_25, %c0_26] : memref<2x10x128xf32, #tpu.memory_space<vmem>>, vector<1x1x32xf32>
    %16 = vector.shape_cast %15 : vector<1x1x32xf32> to vector<1x32xf32>
    %c0_27 = arith.constant 0 : index
    %c2_28 = arith.constant 2 : index
    %c0_29 = arith.constant 0 : index
    %17 = vector.load %arg5[%c0_27, %c2_28, %c0_29] : memref<2x10x128xf32, #tpu.memory_space<vmem>>, vector<1x1x32xf32>
    %18 = vector.shape_cast %17 : vector<1x1x32xf32> to vector<1x32xf32>
    %c0_30 = arith.constant 0 : index
    %c3_31 = arith.constant 3 : index
    %c0_32 = arith.constant 0 : index
    %19 = vector.load %arg5[%c0_30, %c3_31, %c0_32] : memref<2x10x128xf32, #tpu.memory_space<vmem>>, vector<1x1x32xf32>
    %20 = vector.shape_cast %19 : vector<1x1x32xf32> to vector<1x32xf32>
    %c0_33 = arith.constant 0 : index
    %c4 = arith.constant 4 : index
    %c0_34 = arith.constant 0 : index
    %21 = vector.load %arg5[%c0_33, %c4, %c0_34] : memref<2x10x128xf32, #tpu.memory_space<vmem>>, vector<1x1x32xf32>
    %22 = vector.shape_cast %21 : vector<1x1x32xf32> to vector<1x32xf32>
    %c0_35 = arith.constant 0 : index
    %c5 = arith.constant 5 : index
    %c0_36 = arith.constant 0 : index
    %23 = vector.load %arg5[%c0_35, %c5, %c0_36] : memref<2x10x128xf32, #tpu.memory_space<vmem>>, vector<1x1x32xf32>
    %24 = vector.shape_cast %23 : vector<1x1x32xf32> to vector<1x32xf32>
    %c0_37 = arith.constant 0 : index
    %c6 = arith.constant 6 : index
    %c0_38 = arith.constant 0 : index
    %25 = vector.load %arg5[%c0_37, %c6, %c0_38] : memref<2x10x128xf32, #tpu.memory_space<vmem>>, vector<1x1x64xf32>
    %26 = vector.shape_cast %25 : vector<1x1x64xf32> to vector<1x64xf32>
    %c0_39 = arith.constant 0 : index
    %c7 = arith.constant 7 : index
    %c0_40 = arith.constant 0 : index
    %27 = vector.load %arg5[%c0_39, %c7, %c0_40] : memref<2x10x128xf32, #tpu.memory_space<vmem>>, vector<1x1x32xf32>
    %28 = vector.shape_cast %27 : vector<1x1x32xf32> to vector<1x32xf32>
    %c0_41 = arith.constant 0 : index
    %c8 = arith.constant 8 : index
    %c0_42 = arith.constant 0 : index
    %29 = vector.load %arg5[%c0_41, %c8, %c0_42] : memref<2x10x128xf32, #tpu.memory_space<vmem>>, vector<1x1x32xf32>
    %30 = vector.shape_cast %29 : vector<1x1x32xf32> to vector<1x32xf32>
    %c0_43 = arith.constant 0 : index
    %c9 = arith.constant 9 : index
    %c0_44 = arith.constant 0 : index
    %31 = vector.load %arg5[%c0_43, %c9, %c0_44] : memref<2x10x128xf32, #tpu.memory_space<vmem>>, vector<1x1x32xf32>
    %32 = vector.shape_cast %31 : vector<1x1x32xf32> to vector<1x32xf32>
    %cst = arith.constant dense<0.000000e+00> : vector<3x8xf32>
    %33 = vector.multi_reduction <add>, %0, %cst [2] : vector<3x8x32xf32> to vector<3x8xf32>
    %34 = vector.shape_cast %33 : vector<3x8xf32> to vector<3x8x1xf32>
    %cst_45 = arith.constant 3.200000e+01 : f32
    %35 = vector.broadcast %cst_45 : f32 to vector<3x8x1xf32>
    %36 = arith.divf %34, %35 : vector<3x8x1xf32>
    %37 = vector.broadcast %36 : vector<3x8x1xf32> to vector<3x8x32xf32>
    %38 = arith.subf %0, %37 : vector<3x8x32xf32>
    %39 = arith.mulf %38, %38 : vector<3x8x32xf32>
    %cst_46 = arith.constant dense<0.000000e+00> : vector<3x8xf32>
    %40 = vector.multi_reduction <add>, %39, %cst_46 [2] : vector<3x8x32xf32> to vector<3x8xf32>
    %41 = vector.shape_cast %40 : vector<3x8xf32> to vector<3x8x1xf32>
    %cst_47 = arith.constant 3.200000e+01 : f32
    %42 = vector.broadcast %cst_47 : f32 to vector<3x8x1xf32>
    %43 = arith.divf %41, %42 : vector<3x8x1xf32>
    %44 = vector.broadcast %36 : vector<3x8x1xf32> to vector<3x8x32xf32>
    %45 = arith.subf %0, %44 : vector<3x8x32xf32>
    %cst_48 = arith.constant 9.99999996E-13 : f32
    %46 = vector.broadcast %cst_48 : f32 to vector<3x8x1xf32>
    %47 = arith.addf %43, %46 : vector<3x8x1xf32>
    %48 = math.rsqrt %47 : vector<3x8x1xf32>
    %49 = vector.broadcast %48 : vector<3x8x1xf32> to vector<3x8x32xf32>
    %50 = arith.mulf %45, %49 : vector<3x8x32xf32>
    %51 = vector.shape_cast %22 : vector<1x32xf32> to vector<1x1x32xf32>
    %52 = vector.broadcast %51 : vector<1x1x32xf32> to vector<3x8x32xf32>
    %53 = arith.mulf %50, %52 : vector<3x8x32xf32>
    %54 = vector.shape_cast %24 : vector<1x32xf32> to vector<1x1x32xf32>
    %55 = vector.broadcast %54 : vector<1x1x32xf32> to vector<3x8x32xf32>
    %56 = arith.addf %53, %55 : vector<3x8x32xf32>
    %57 = vector.shape_cast %56 : vector<3x8x32xf32> to vector<24x32xf32>
    %cst_49 = arith.constant dense<0.000000e+00> : vector<24x32xf32>
    %58 = tpu.matmul %57, %2, %cst_49 {dimension_numbers = #tpu.dot_dimension_numbers<[1], [0], [0], [1], [0, 0, 1, 1], [], []>} : vector<24x32xf32>, vector<32x32xf32>, vector<24x32xf32> -> vector<24x32xf32>
    %59 = vector.broadcast %14 : vector<1x32xf32> to vector<24x32xf32>
    %60 = arith.addf %58, %59 : vector<24x32xf32>
    %61 = vector.shape_cast %60 : vector<24x32xf32> to vector<3x8x32xf32>
    %cst_50 = arith.constant dense<0.000000e+00> : vector<24x32xf32>
    %62 = tpu.matmul %57, %4, %cst_50 {dimension_numbers = #tpu.dot_dimension_numbers<[1], [0], [0], [1], [0, 0, 1, 1], [], []>} : vector<24x32xf32>, vector<32x32xf32>, vector<24x32xf32> -> vector<24x32xf32>
    %63 = vector.broadcast %16 : vector<1x32xf32> to vector<24x32xf32>
    %64 = arith.addf %62, %63 : vector<24x32xf32>
    %65 = vector.shape_cast %64 : vector<24x32xf32> to vector<3x8x32xf32>
    %cst_51 = arith.constant dense<0.000000e+00> : vector<24x32xf32>
    %66 = tpu.matmul %57, %6, %cst_51 {dimension_numbers = #tpu.dot_dimension_numbers<[1], [0], [0], [1], [0, 0, 1, 1], [], []>} : vector<24x32xf32>, vector<32x32xf32>, vector<24x32xf32> -> vector<24x32xf32>
    %67 = vector.broadcast %18 : vector<1x32xf32> to vector<24x32xf32>
    %68 = arith.addf %66, %67 : vector<24x32xf32>
    %69 = vector.shape_cast %68 : vector<24x32xf32> to vector<3x8x32xf32>
    "tpu.trace_start"() <{level = 10 : i32, message = "bqd,bkd->bqk"}> : () -> ()
    %cst_52 = arith.constant dense<0.000000e+00> : vector<3x8x8xf32>
    %70 = tpu.matmul %61, %65, %cst_52 {dimension_numbers = #tpu.dot_dimension_numbers<[2], [2], [1], [1], [0, 0, 0, 1, 1, 1], [0], [0]>} : vector<3x8x32xf32>, vector<3x8x32xf32>, vector<3x8x8xf32> -> vector<3x8x8xf32>
    "tpu.trace_stop"() : () -> ()
    %cst_53 = arith.constant 0.176776692 : f32
    %71 = vector.broadcast %cst_53 : f32 to vector<3x8x8xf32>
    %72 = arith.mulf %70, %71 : vector<3x8x8xf32>
    %cst_54 = arith.constant dense<0xFF800000> : vector<3x8xf32>
    %73 = vector.multi_reduction <maximumf>, %72, %cst_54 [2] : vector<3x8x8xf32> to vector<3x8xf32>
    %74 = vector.shape_cast %73 : vector<3x8xf32> to vector<3x8x1xf32>
    %75 = vector.broadcast %74 : vector<3x8x1xf32> to vector<3x8x8xf32>
    %76 = arith.subf %72, %75 : vector<3x8x8xf32>
    %77 = math.exp %76 : vector<3x8x8xf32>
    %cst_55 = arith.constant dense<0.000000e+00> : vector<3x8xf32>
    %78 = vector.multi_reduction <add>, %77, %cst_55 [2] : vector<3x8x8xf32> to vector<3x8xf32>
    %79 = vector.shape_cast %78 : vector<3x8xf32> to vector<3x8x1xf32>
    %80 = tpu.reciprocal %79 {approx = true} : vector<3x8x1xf32> -> vector<3x8x1xf32>
    %81 = vector.broadcast %80 : vector<3x8x1xf32> to vector<3x8x8xf32>
    %82 = arith.mulf %77, %81 : vector<3x8x8xf32>
    "tpu.trace_start"() <{level = 10 : i32, message = "bqk,bkd->bqd"}> : () -> ()
    %cst_56 = arith.constant dense<0.000000e+00> : vector<3x8x32xf32>
    %83 = tpu.matmul %82, %69, %cst_56 {dimension_numbers = #tpu.dot_dimension_numbers<[2], [1], [1], [2], [0, 0, 0, 1, 1, 2], [0], [0]>} : vector<3x8x8xf32>, vector<3x8x32xf32>, vector<3x8x32xf32> -> vector<3x8x32xf32>
    "tpu.trace_stop"() : () -> ()
    %84 = vector.shape_cast %83 : vector<3x8x32xf32> to vector<24x32xf32>
    %cst_57 = arith.constant dense<0.000000e+00> : vector<24x32xf32>
    %85 = tpu.matmul %84, %8, %cst_57 {dimension_numbers = #tpu.dot_dimension_numbers<[1], [0], [0], [1], [0, 0, 1, 1], [], []>} : vector<24x32xf32>, vector<32x32xf32>, vector<24x32xf32> -> vector<24x32xf32>
    %86 = vector.broadcast %20 : vector<1x32xf32> to vector<24x32xf32>
    %87 = arith.addf %85, %86 : vector<24x32xf32>
    %88 = vector.shape_cast %87 : vector<24x32xf32> to vector<3x8x32xf32>
    %89 = arith.addf %0, %88 : vector<3x8x32xf32>
    %cst_58 = arith.constant dense<0.000000e+00> : vector<3x8xf32>
    %90 = vector.multi_reduction <add>, %89, %cst_58 [2] : vector<3x8x32xf32> to vector<3x8xf32>
    %91 = vector.shape_cast %90 : vector<3x8xf32> to vector<3x8x1xf32>
    %cst_59 = arith.constant 3.200000e+01 : f32
    %92 = vector.broadcast %cst_59 : f32 to vector<3x8x1xf32>
    %93 = arith.divf %91, %92 : vector<3x8x1xf32>
    %94 = vector.broadcast %93 : vector<3x8x1xf32> to vector<3x8x32xf32>
    %95 = arith.subf %89, %94 : vector<3x8x32xf32>
    %96 = arith.mulf %95, %95 : vector<3x8x32xf32>
    %cst_60 = arith.constant dense<0.000000e+00> : vector<3x8xf32>
    %97 = vector.multi_reduction <add>, %96, %cst_60 [2] : vector<3x8x32xf32> to vector<3x8xf32>
    %98 = vector.shape_cast %97 : vector<3x8xf32> to vector<3x8x1xf32>
    %cst_61 = arith.constant 3.200000e+01 : f32
    %99 = vector.broadcast %cst_61 : f32 to vector<3x8x1xf32>
    %100 = arith.divf %98, %99 : vector<3x8x1xf32>
    %101 = vector.broadcast %93 : vector<3x8x1xf32> to vector<3x8x32xf32>
    %102 = arith.subf %89, %101 : vector<3x8x32xf32>
    %cst_62 = arith.constant 9.99999996E-13 : f32
    %103 = vector.broadcast %cst_62 : f32 to vector<3x8x1xf32>
    %104 = arith.addf %100, %103 : vector<3x8x1xf32>
    %105 = math.rsqrt %104 : vector<3x8x1xf32>
    %106 = vector.broadcast %105 : vector<3x8x1xf32> to vector<3x8x32xf32>
    %107 = arith.mulf %102, %106 : vector<3x8x32xf32>
    %108 = vector.shape_cast %30 : vector<1x32xf32> to vector<1x1x32xf32>
    %109 = vector.broadcast %108 : vector<1x1x32xf32> to vector<3x8x32xf32>
    %110 = arith.mulf %107, %109 : vector<3x8x32xf32>
    %111 = vector.shape_cast %32 : vector<1x32xf32> to vector<1x1x32xf32>
    %112 = vector.broadcast %111 : vector<1x1x32xf32> to vector<3x8x32xf32>
    %113 = arith.addf %110, %112 : vector<3x8x32xf32>
    %114 = vector.shape_cast %113 : vector<3x8x32xf32> to vector<24x32xf32>
    %cst_63 = arith.constant dense<0.000000e+00> : vector<24x64xf32>
    %115 = tpu.matmul %114, %10, %cst_63 {dimension_numbers = #tpu.dot_dimension_numbers<[1], [0], [0], [1], [0, 0, 1, 1], [], []>} : vector<24x32xf32>, vector<32x64xf32>, vector<24x64xf32> -> vector<24x64xf32>
    %116 = vector.broadcast %26 : vector<1x64xf32> to vector<24x64xf32>
    %117 = arith.addf %115, %116 : vector<24x64xf32>
    %118 = arith.mulf %117, %117 : vector<24x64xf32>
    %119 = arith.mulf %117, %118 : vector<24x64xf32>
    %cst_64 = arith.constant 4.471500e-02 : f32
    %120 = vector.broadcast %cst_64 : f32 to vector<24x64xf32>
    %121 = arith.mulf %120, %119 : vector<24x64xf32>
    %122 = arith.addf %117, %121 : vector<24x64xf32>
    %cst_65 = arith.constant 0.797884583 : f32
    %123 = vector.broadcast %cst_65 : f32 to vector<24x64xf32>
    %124 = arith.mulf %123, %122 : vector<24x64xf32>
    %125 = math.tanh %124 : vector<24x64xf32>
    %cst_66 = arith.constant 1.000000e+00 : f32
    %126 = vector.broadcast %cst_66 : f32 to vector<24x64xf32>
    %127 = arith.addf %126, %125 : vector<24x64xf32>
    %cst_67 = arith.constant 5.000000e-01 : f32
    %128 = vector.broadcast %cst_67 : f32 to vector<24x64xf32>
    %129 = arith.mulf %128, %127 : vector<24x64xf32>
    %130 = arith.mulf %117, %129 : vector<24x64xf32>
    %cst_68 = arith.constant dense<0.000000e+00> : vector<24x32xf32>
    %131 = tpu.matmul %130, %12, %cst_68 {dimension_numbers = #tpu.dot_dimension_numbers<[1], [0], [0], [1], [0, 0, 1, 1], [], []>} : vector<24x64xf32>, vector<64x32xf32>, vector<24x32xf32> -> vector<24x32xf32>
    %132 = vector.broadcast %28 : vector<1x32xf32> to vector<24x32xf32>
    %133 = arith.addf %131, %132 : vector<24x32xf32>
    %134 = vector.shape_cast %133 : vector<24x32xf32> to vector<3x8x32xf32>
    %135 = arith.addf %89, %134 : vector<3x8x32xf32>
    %c1_69 = arith.constant 1 : index
    %c0_70 = arith.constant 0 : index
    %c0_71 = arith.constant 0 : index
    %c0_72 = arith.constant 0 : index
    %136 = vector.load %arg2[%c1_69, %c0_70, %c0_71, %c0_72] : memref<2x4x32x32xf32, #tpu.memory_space<vmem>>, vector<1x1x32x32xf32>
    %137 = vector.shape_cast %136 : vector<1x1x32x32xf32> to vector<32x32xf32>
    %c1_73 = arith.constant 1 : index
    %c1_74 = arith.constant 1 : index
    %c0_75 = arith.constant 0 : index
    %c0_76 = arith.constant 0 : index
    %138 = vector.load %arg2[%c1_73, %c1_74, %c0_75, %c0_76] : memref<2x4x32x32xf32, #tpu.memory_space<vmem>>, vector<1x1x32x32xf32>
    %139 = vector.shape_cast %138 : vector<1x1x32x32xf32> to vector<32x32xf32>
    %c1_77 = arith.constant 1 : index
    %c2_78 = arith.constant 2 : index
    %c0_79 = arith.constant 0 : index
    %c0_80 = arith.constant 0 : index
    %140 = vector.load %arg2[%c1_77, %c2_78, %c0_79, %c0_80] : memref<2x4x32x32xf32, #tpu.memory_space<vmem>>, vector<1x1x32x32xf32>
    %141 = vector.shape_cast %140 : vector<1x1x32x32xf32> to vector<32x32xf32>
    %c1_81 = arith.constant 1 : index
    %c3_82 = arith.constant 3 : index
    %c0_83 = arith.constant 0 : index
    %c0_84 = arith.constant 0 : index
    %142 = vector.load %arg2[%c1_81, %c3_82, %c0_83, %c0_84] : memref<2x4x32x32xf32, #tpu.memory_space<vmem>>, vector<1x1x32x32xf32>
    %143 = vector.shape_cast %142 : vector<1x1x32x32xf32> to vector<32x32xf32>
    %c1_85 = arith.constant 1 : index
    %c0_86 = arith.constant 0 : index
    %c0_87 = arith.constant 0 : index
    %144 = vector.load %arg3[%c1_85, %c0_86, %c0_87] : memref<2x32x64xf32, #tpu.memory_space<vmem>>, vector<1x32x64xf32>
    %145 = vector.shape_cast %144 : vector<1x32x64xf32> to vector<32x64xf32>
    %c1_88 = arith.constant 1 : index
    %c0_89 = arith.constant 0 : index
    %c0_90 = arith.constant 0 : index
    %146 = vector.load %arg4[%c1_88, %c0_89, %c0_90] : memref<2x64x32xf32, #tpu.memory_space<vmem>>, vector<1x64x32xf32>
    %147 = vector.shape_cast %146 : vector<1x64x32xf32> to vector<64x32xf32>
    %c1_91 = arith.constant 1 : index
    %c0_92 = arith.constant 0 : index
    %c0_93 = arith.constant 0 : index
    %148 = vector.load %arg5[%c1_91, %c0_92, %c0_93] : memref<2x10x128xf32, #tpu.memory_space<vmem>>, vector<1x1x32xf32>
    %149 = vector.shape_cast %148 : vector<1x1x32xf32> to vector<1x32xf32>
    %c1_94 = arith.constant 1 : index
    %c1_95 = arith.constant 1 : index
    %c0_96 = arith.constant 0 : index
    %150 = vector.load %arg5[%c1_94, %c1_95, %c0_96] : memref<2x10x128xf32, #tpu.memory_space<vmem>>, vector<1x1x32xf32>
    %151 = vector.shape_cast %150 : vector<1x1x32xf32> to vector<1x32xf32>
    %c1_97 = arith.constant 1 : index
    %c2_98 = arith.constant 2 : index
    %c0_99 = arith.constant 0 : index
    %152 = vector.load %arg5[%c1_97, %c2_98, %c0_99] : memref<2x10x128xf32, #tpu.memory_space<vmem>>, vector<1x1x32xf32>
    %153 = vector.shape_cast %152 : vector<1x1x32xf32> to vector<1x32xf32>
    %c1_100 = arith.constant 1 : index
    %c3_101 = arith.constant 3 : index
    %c0_102 = arith.constant 0 : index
    %154 = vector.load %arg5[%c1_100, %c3_101, %c0_102] : memref<2x10x128xf32, #tpu.memory_space<vmem>>, vector<1x1x32xf32>
    %155 = vector.shape_cast %154 : vector<1x1x32xf32> to vector<1x32xf32>
    %c1_103 = arith.constant 1 : index
    %c4_104 = arith.constant 4 : index
    %c0_105 = arith.constant 0 : index
    %156 = vector.load %arg5[%c1_103, %c4_104, %c0_105] : memref<2x10x128xf32, #tpu.memory_space<vmem>>, vector<1x1x32xf32>
    %157 = vector.shape_cast %156 : vector<1x1x32xf32> to vector<1x32xf32>
    %c1_106 = arith.constant 1 : index
    %c5_107 = arith.constant 5 : index
    %c0_108 = arith.constant 0 : index
    %158 = vector.load %arg5[%c1_106, %c5_107, %c0_108] : memref<2x10x128xf32, #tpu.memory_space<vmem>>, vector<1x1x32xf32>
    %159 = vector.shape_cast %158 : vector<1x1x32xf32> to vector<1x32xf32>
    %c1_109 = arith.constant 1 : index
    %c6_110 = arith.constant 6 : index
    %c0_111 = arith.constant 0 : index
    %160 = vector.load %arg5[%c1_109, %c6_110, %c0_111] : memref<2x10x128xf32, #tpu.memory_space<vmem>>, vector<1x1x64xf32>
    %161 = vector.shape_cast %160 : vector<1x1x64xf32> to vector<1x64xf32>
    %c1_112 = arith.constant 1 : index
    %c7_113 = arith.constant 7 : index
    %c0_114 = arith.constant 0 : index
    %162 = vector.load %arg5[%c1_112, %c7_113, %c0_114] : memref<2x10x128xf32, #tpu.memory_space<vmem>>, vector<1x1x32xf32>
    %163 = vector.shape_cast %162 : vector<1x1x32xf32> to vector<1x32xf32>
    %c1_115 = arith.constant 1 : index
    %c8_116 = arith.constant 8 : index
    %c0_117 = arith.constant 0 : index
    %164 = vector.load %arg5[%c1_115, %c8_116, %c0_117] : memref<2x10x128xf32, #tpu.memory_space<vmem>>, vector<1x1x32xf32>
    %165 = vector.shape_cast %164 : vector<1x1x32xf32> to vector<1x32xf32>
    %c1_118 = arith.constant 1 : index
    %c9_119 = arith.constant 9 : index
    %c0_120 = arith.constant 0 : index
    %166 = vector.load %arg5[%c1_118, %c9_119, %c0_120] : memref<2x10x128xf32, #tpu.memory_space<vmem>>, vector<1x1x32xf32>
    %167 = vector.shape_cast %166 : vector<1x1x32xf32> to vector<1x32xf32>
    %cst_121 = arith.constant dense<0.000000e+00> : vector<3x8xf32>
    %168 = vector.multi_reduction <add>, %135, %cst_121 [2] : vector<3x8x32xf32> to vector<3x8xf32>
    %169 = vector.shape_cast %168 : vector<3x8xf32> to vector<3x8x1xf32>
    %cst_122 = arith.constant 3.200000e+01 : f32
    %170 = vector.broadcast %cst_122 : f32 to vector<3x8x1xf32>
    %171 = arith.divf %169, %170 : vector<3x8x1xf32>
    %172 = vector.broadcast %171 : vector<3x8x1xf32> to vector<3x8x32xf32>
    %173 = arith.subf %135, %172 : vector<3x8x32xf32>
    %174 = arith.mulf %173, %173 : vector<3x8x32xf32>
    %cst_123 = arith.constant dense<0.000000e+00> : vector<3x8xf32>
    %175 = vector.multi_reduction <add>, %174, %cst_123 [2] : vector<3x8x32xf32> to vector<3x8xf32>
    %176 = vector.shape_cast %175 : vector<3x8xf32> to vector<3x8x1xf32>
    %cst_124 = arith.constant 3.200000e+01 : f32
    %177 = vector.broadcast %cst_124 : f32 to vector<3x8x1xf32>
    %178 = arith.divf %176, %177 : vector<3x8x1xf32>
    %179 = vector.broadcast %171 : vector<3x8x1xf32> to vector<3x8x32xf32>
    %180 = arith.subf %135, %179 : vector<3x8x32xf32>
    %cst_125 = arith.constant 9.99999996E-13 : f32
    %181 = vector.broadcast %cst_125 : f32 to vector<3x8x1xf32>
    %182 = arith.addf %178, %181 : vector<3x8x1xf32>
    %183 = math.rsqrt %182 : vector<3x8x1xf32>
    %184 = vector.broadcast %183 : vector<3x8x1xf32> to vector<3x8x32xf32>
    %185 = arith.mulf %180, %184 : vector<3x8x32xf32>
    %186 = vector.shape_cast %157 : vector<1x32xf32> to vector<1x1x32xf32>
    %187 = vector.broadcast %186 : vector<1x1x32xf32> to vector<3x8x32xf32>
    %188 = arith.mulf %185, %187 : vector<3x8x32xf32>
    %189 = vector.shape_cast %159 : vector<1x32xf32> to vector<1x1x32xf32>
    %190 = vector.broadcast %189 : vector<1x1x32xf32> to vector<3x8x32xf32>
    %191 = arith.addf %188, %190 : vector<3x8x32xf32>
    %192 = vector.shape_cast %191 : vector<3x8x32xf32> to vector<24x32xf32>
    %cst_126 = arith.constant dense<0.000000e+00> : vector<24x32xf32>
    %193 = tpu.matmul %192, %137, %cst_126 {dimension_numbers = #tpu.dot_dimension_numbers<[1], [0], [0], [1], [0, 0, 1, 1], [], []>} : vector<24x32xf32>, vector<32x32xf32>, vector<24x32xf32> -> vector<24x32xf32>
    %194 = vector.broadcast %149 : vector<1x32xf32> to vector<24x32xf32>
    %195 = arith.addf %193, %194 : vector<24x32xf32>
    %196 = vector.shape_cast %195 : vector<24x32xf32> to vector<3x8x32xf32>
    %cst_127 = arith.constant dense<0.000000e+00> : vector<24x32xf32>
    %197 = tpu.matmul %192, %139, %cst_127 {dimension_numbers = #tpu.dot_dimension_numbers<[1], [0], [0], [1], [0, 0, 1, 1], [], []>} : vector<24x32xf32>, vector<32x32xf32>, vector<24x32xf32> -> vector<24x32xf32>
    %198 = vector.broadcast %151 : vector<1x32xf32> to vector<24x32xf32>
    %199 = arith.addf %197, %198 : vector<24x32xf32>
    %200 = vector.shape_cast %199 : vector<24x32xf32> to vector<3x8x32xf32>
    %cst_128 = arith.constant dense<0.000000e+00> : vector<24x32xf32>
    %201 = tpu.matmul %192, %141, %cst_128 {dimension_numbers = #tpu.dot_dimension_numbers<[1], [0], [0], [1], [0, 0, 1, 1], [], []>} : vector<24x32xf32>, vector<32x32xf32>, vector<24x32xf32> -> vector<24x32xf32>
    %202 = vector.broadcast %153 : vector<1x32xf32> to vector<24x32xf32>
    %203 = arith.addf %201, %202 : vector<24x32xf32>
    %204 = vector.shape_cast %203 : vector<24x32xf32> to vector<3x8x32xf32>
    "tpu.trace_start"() <{level = 10 : i32, message = "bqd,bkd->bqk"}> : () -> ()
    %cst_129 = arith.constant dense<0.000000e+00> : vector<3x8x8xf32>
    %205 = tpu.matmul %196, %200, %cst_129 {dimension_numbers = #tpu.dot_dimension_numbers<[2], [2], [1], [1], [0, 0, 0, 1, 1, 1], [0], [0]>} : vector<3x8x32xf32>, vector<3x8x32xf32>, vector<3x8x8xf32> -> vector<3x8x8xf32>
    "tpu.trace_stop"() : () -> ()
    %cst_130 = arith.constant 0.176776692 : f32
    %206 = vector.broadcast %cst_130 : f32 to vector<3x8x8xf32>
    %207 = arith.mulf %205, %206 : vector<3x8x8xf32>
    %cst_131 = arith.constant dense<0xFF800000> : vector<3x8xf32>
    %208 = vector.multi_reduction <maximumf>, %207, %cst_131 [2] : vector<3x8x8xf32> to vector<3x8xf32>
    %209 = vector.shape_cast %208 : vector<3x8xf32> to vector<3x8x1xf32>
    %210 = vector.broadcast %209 : vector<3x8x1xf32> to vector<3x8x8xf32>
    %211 = arith.subf %207, %210 : vector<3x8x8xf32>
    %212 = math.exp %211 : vector<3x8x8xf32>
    %cst_132 = arith.constant dense<0.000000e+00> : vector<3x8xf32>
    %213 = vector.multi_reduction <add>, %212, %cst_132 [2] : vector<3x8x8xf32> to vector<3x8xf32>
    %214 = vector.shape_cast %213 : vector<3x8xf32> to vector<3x8x1xf32>
    %215 = tpu.reciprocal %214 {approx = true} : vector<3x8x1xf32> -> vector<3x8x1xf32>
    %216 = vector.broadcast %215 : vector<3x8x1xf32> to vector<3x8x8xf32>
    %217 = arith.mulf %212, %216 : vector<3x8x8xf32>
    "tpu.trace_start"() <{level = 10 : i32, message = "bqk,bkd->bqd"}> : () -> ()
    %cst_133 = arith.constant dense<0.000000e+00> : vector<3x8x32xf32>
    %218 = tpu.matmul %217, %204, %cst_133 {dimension_numbers = #tpu.dot_dimension_numbers<[2], [1], [1], [2], [0, 0, 0, 1, 1, 2], [0], [0]>} : vector<3x8x8xf32>, vector<3x8x32xf32>, vector<3x8x32xf32> -> vector<3x8x32xf32>
    "tpu.trace_stop"() : () -> ()
    %219 = vector.shape_cast %218 : vector<3x8x32xf32> to vector<24x32xf32>
    %cst_134 = arith.constant dense<0.000000e+00> : vector<24x32xf32>
    %220 = tpu.matmul %219, %143, %cst_134 {dimension_numbers = #tpu.dot_dimension_numbers<[1], [0], [0], [1], [0, 0, 1, 1], [], []>} : vector<24x32xf32>, vector<32x32xf32>, vector<24x32xf32> -> vector<24x32xf32>
    %221 = vector.broadcast %155 : vector<1x32xf32> to vector<24x32xf32>
    %222 = arith.addf %220, %221 : vector<24x32xf32>
    %223 = vector.shape_cast %222 : vector<24x32xf32> to vector<3x8x32xf32>
    %224 = arith.addf %135, %223 : vector<3x8x32xf32>
    %cst_135 = arith.constant dense<0.000000e+00> : vector<3x8xf32>
    %225 = vector.multi_reduction <add>, %224, %cst_135 [2] : vector<3x8x32xf32> to vector<3x8xf32>
    %226 = vector.shape_cast %225 : vector<3x8xf32> to vector<3x8x1xf32>
    %cst_136 = arith.constant 3.200000e+01 : f32
    %227 = vector.broadcast %cst_136 : f32 to vector<3x8x1xf32>
    %228 = arith.divf %226, %227 : vector<3x8x1xf32>
    %229 = vector.broadcast %228 : vector<3x8x1xf32> to vector<3x8x32xf32>
    %230 = arith.subf %224, %229 : vector<3x8x32xf32>
    %231 = arith.mulf %230, %230 : vector<3x8x32xf32>
    %cst_137 = arith.constant dense<0.000000e+00> : vector<3x8xf32>
    %232 = vector.multi_reduction <add>, %231, %cst_137 [2] : vector<3x8x32xf32> to vector<3x8xf32>
    %233 = vector.shape_cast %232 : vector<3x8xf32> to vector<3x8x1xf32>
    %cst_138 = arith.constant 3.200000e+01 : f32
    %234 = vector.broadcast %cst_138 : f32 to vector<3x8x1xf32>
    %235 = arith.divf %233, %234 : vector<3x8x1xf32>
    %236 = vector.broadcast %228 : vector<3x8x1xf32> to vector<3x8x32xf32>
    %237 = arith.subf %224, %236 : vector<3x8x32xf32>
    %cst_139 = arith.constant 9.99999996E-13 : f32
    %238 = vector.broadcast %cst_139 : f32 to vector<3x8x1xf32>
    %239 = arith.addf %235, %238 : vector<3x8x1xf32>
    %240 = math.rsqrt %239 : vector<3x8x1xf32>
    %241 = vector.broadcast %240 : vector<3x8x1xf32> to vector<3x8x32xf32>
    %242 = arith.mulf %237, %241 : vector<3x8x32xf32>
    %243 = vector.shape_cast %165 : vector<1x32xf32> to vector<1x1x32xf32>
    %244 = vector.broadcast %243 : vector<1x1x32xf32> to vector<3x8x32xf32>
    %245 = arith.mulf %242, %244 : vector<3x8x32xf32>
    %246 = vector.shape_cast %167 : vector<1x32xf32> to vector<1x1x32xf32>
    %247 = vector.broadcast %246 : vector<1x1x32xf32> to vector<3x8x32xf32>
    %248 = arith.addf %245, %247 : vector<3x8x32xf32>
    %249 = vector.shape_cast %248 : vector<3x8x32xf32> to vector<24x32xf32>
    %cst_140 = arith.constant dense<0.000000e+00> : vector<24x64xf32>
    %250 = tpu.matmul %249, %145, %cst_140 {dimension_numbers = #tpu.dot_dimension_numbers<[1], [0], [0], [1], [0, 0, 1, 1], [], []>} : vector<24x32xf32>, vector<32x64xf32>, vector<24x64xf32> -> vector<24x64xf32>
    %251 = vector.broadcast %161 : vector<1x64xf32> to vector<24x64xf32>
    %252 = arith.addf %250, %251 : vector<24x64xf32>
    %253 = arith.mulf %252, %252 : vector<24x64xf32>
    %254 = arith.mulf %252, %253 : vector<24x64xf32>
    %cst_141 = arith.constant 4.471500e-02 : f32
    %255 = vector.broadcast %cst_141 : f32 to vector<24x64xf32>
    %256 = arith.mulf %255, %254 : vector<24x64xf32>
    %257 = arith.addf %252, %256 : vector<24x64xf32>
    %cst_142 = arith.constant 0.797884583 : f32
    %258 = vector.broadcast %cst_142 : f32 to vector<24x64xf32>
    %259 = arith.mulf %258, %257 : vector<24x64xf32>
    %260 = math.tanh %259 : vector<24x64xf32>
    %cst_143 = arith.constant 1.000000e+00 : f32
    %261 = vector.broadcast %cst_143 : f32 to vector<24x64xf32>
    %262 = arith.addf %261, %260 : vector<24x64xf32>
    %cst_144 = arith.constant 5.000000e-01 : f32
    %263 = vector.broadcast %cst_144 : f32 to vector<24x64xf32>
    %264 = arith.mulf %263, %262 : vector<24x64xf32>
    %265 = arith.mulf %252, %264 : vector<24x64xf32>
    %cst_145 = arith.constant dense<0.000000e+00> : vector<24x32xf32>
    %266 = tpu.matmul %265, %147, %cst_145 {dimension_numbers = #tpu.dot_dimension_numbers<[1], [0], [0], [1], [0, 0, 1, 1], [], []>} : vector<24x64xf32>, vector<64x32xf32>, vector<24x32xf32> -> vector<24x32xf32>
    %267 = vector.broadcast %163 : vector<1x32xf32> to vector<24x32xf32>
    %268 = arith.addf %266, %267 : vector<24x32xf32>
    %269 = vector.shape_cast %268 : vector<24x32xf32> to vector<3x8x32xf32>
    %270 = arith.addf %224, %269 : vector<3x8x32xf32>
    %c0_146 = arith.constant 0 : index
    %c0_147 = arith.constant 0 : index
    %c0_148 = arith.constant 0 : index
    %271 = vector.load %arg6[%c0_146, %c0_147, %c0_148] : memref<3x8x32xf32, #tpu.memory_space<vmem>>, vector<3x8x32xf32>
    tpu.vector_store %arg6[%c0_146, %c0_147, %c0_148], %270 {strides = array<i32>} : memref<3x8x32xf32, #tpu.memory_space<vmem>>, vector<3x8x32xf32>,
    return
  }
  func.func @transform_0(%arg0: i32) -> (i32, i32, i32) {
    %c0_i32 = arith.constant 0 : i32
    %c0_i32_0 = arith.constant 0 : i32
    %c0_i32_1 = arith.constant 0 : i32
    return %arg0, %c0_i32, %c0_i32_0 : i32, i32, i32
  }
  func.func @transform_1(%arg0: i32) -> (i32, i32, i32, i32) {
    %c0_i32 = arith.constant 0 : i32
    %c0_i32_0 = arith.constant 0 : i32
    %c0_i32_1 = arith.constant 0 : i32
    %c0_i32_2 = arith.constant 0 : i32
    %c0_i32_3 = arith.constant 0 : i32
    return %c0_i32, %c0_i32_0, %c0_i32_1, %c0_i32_2 : i32, i32, i32, i32
  }
  func.func @transform_2(%arg0: i32) -> (i32, i32, i32) {
    %c0_i32 = arith.constant 0 : i32
    %c0_i32_0 = arith.constant 0 : i32
    %c0_i32_1 = arith.constant 0 : i32
    %c0_i32_2 = arith.constant 0 : i32
    return %c0_i32, %c0_i32_0, %c0_i32_1 : i32, i32, i32
  }
  func.func @transform_3(%arg0: i32) -> (i32, i32, i32) {
    %c0_i32 = arith.constant 0 : i32
    %c0_i32_0 = arith.constant 0 : i32
    %c0_i32_1 = arith.constant 0 : i32
    %c0_i32_2 = arith.constant 0 : i32
    return %c0_i32, %c0_i32_0, %c0_i32_1 : i32, i32, i32
  }
  func.func @transform_4(%arg0: i32) -> (i32, i32, i32) {
    %c0_i32 = arith.constant 0 : i32
    %c0_i32_0 = arith.constant 0 : i32
    %c0_i32_1 = arith.constant 0 : i32
    %c0_i32_2 = arith.constant 0 : i32
    return %c0_i32, %c0_i32_0, %c0_i32_1 : i32, i32, i32
  }
  func.func @transform_5(%arg0: i32) -> (i32, i32, i32) {
    %c0_i32 = arith.constant 0 : i32
    %c0_i32_0 = arith.constant 0 : i32
    %c0_i32_1 = arith.constant 0 : i32
    return %arg0, %c0_i32, %c0_i32_0 : i32, i32, i32
  }
}

</mosaic_0001>

<bundles_post_ra>
// kernel: smiles_encoder_forward.1
= control target key start
LH: loop header
LB: loop body
LE: loop exit
PB: predicated region body
PF: predicated region fallthrough
CT: control target
= control target key end

     0   :  { %s3351_s18 = smov 0   ;;  %s3932_s0 = inlined_call_operand.vmem [shape: f32[6,8,32], index: 0, kind: input, shape index: {}]   ;;  %s3933_s1 = inlined_call_operand.vmem [shape: f32[2,4,32,32], index: 1, kind: input, shape index: {}]   ;;  %s3934_s2 = inlined_call_operand.vmem [shape: f32[2,32,64], index: 2, kind: input, shape index: {}]   ;;  %s3935_s3 = inlined_call_operand.vmem [shape: f32[2,64,32], index: 3, kind: input, shape index: {}]   ;;  %s3936_s4 = inlined_call_operand.vmem [shape: f32[2,10,128], index: 4, kind: input, shape index: {}]   ;;  %s3937_s5 = inlined_call_operand.vmem [shape: f32[6,8,32], index: 5, kind: output, shape index: {}]  }
   0x1 LB: > { %s2704_s19 = sadd.s32 4294967295, %s3317_s18   ;;  %p2708_p0 = scmp.ge.s32.totalorder %s3317_s18, 1  ;;  %s3317_s18 = sphi %s3351_s18, %s15_s18  }
   0x2   : > { %p188_p1 = scmp.lt.s32.totalorder %s3317_s18, 3 }
   0x4   : > { %p189_p2 = pnand %p2708_p0, %p188_p1 }
   0x5   : > { %s216_s20 = smul.u32 (!%p189_p2), 3, %s2704_s19 }
   0x6   : > { %192 = sbr.rel (%p189_p2) target bundleno = 4303 (0x10cf), region = 40 }
   0x7   : > { %p217_p3 = scmp.lt.s32.totalorder (!%p189_p2), %s216_s20, 5 }
   0xb   : > { %s3939_s20 = smov (!%p217_p3, %s216_s20), 5  ;;  %vm272_vm0 = vcmask 261120   ;;  %v234_v21 = vld [vmem:[%s3933_s1 + $0x18] sm:$0xff]  ;;  %v3319_v23 = vmov 0.0   ;;  %v233_v24 = vld [vmem:[%s3933_s1 + $0x10] sm:$0xff]  ;;  %v232_v26 = vld [vmem:[%s3933_s1 + $0x8] sm:$0xff] }
   0xc   : > { %s2709_s21 = sshll.u32 %s3939_s20, 3  ;;  %v2714_v22 = vld [vmem:[%s3933_s1 + $0x38] sm:$0xff]  ;;  %2953 = vmatprep.subr.mxu0 %v3319_v23  ;;  %2970 = vmatprep.subr.mxu1 %v3319_v23  ;;  %v2713_v25 = vld [vmem:[%s3933_s1 + $0x30] sm:$0xff]  ;;  %v2712_v27 = vld [vmem:[%s3933_s1 + $0x28] sm:$0xff]  ;;  %vm3320_vm1 = vmmov 0   ;;  %vm819_vm2 = vcmask 64512  }
   0xd   : > { %s220_s24 = scalar_lea.vmem %s3932_s0, %s2709_s21  ;;  %2954 = vmatpush3.msra.mxu0 %v234_v21  ;;  %2971 = vmatpush3.msra.mxu1 %v2714_v22  ;;  %v231_v28 = vld [vmem:[%s3933_s1] sm:$0xff]  ;;  %v2718_v48 = vld [vmem:[%s3933_s1 + $0x58] sm:$0xff]  ;;  %v2717_v51 = vld [vmem:[%s3933_s1 + $0x50] sm:$0xff]  ;;  %vm1345_vm3 = vcmask 523264   ;;  %s226_s25 = scalar_lea.vmem %s3937_s5, %s2709_s21 }
   0xe   : > { %v3367_v0 = vld [vmem:[%s220_s24] sm:$0xff]  ;;  %v3369_v1 = vld [vmem:[%s220_s24 + $0x10] sm:$0xff]  ;;  %v3371_v2 = vld [vmem:[%s220_s24 + $0x8] sm:$0xff]  ;;  %2955 = vmatprep.subr.mxu0 %v3319_v23  ;;  %2972 = vmatprep.subr.mxu1 %v3319_v23 }
   0xf   : > { %v273_v3 = vsel %vm272_vm0, %v3367_v0, 0.0  ;;  %v279_v4 = vsel %vm272_vm0, %v3369_v1, 0.0  ;;  %v276_v5 = vsel %vm272_vm0, %v3371_v2, 0.0  ;;  %2956 = vmatpush3.msra.mxu0 %v233_v24  ;;  %2973 = vmatpush3.msra.mxu1 %v2713_v25  ;;  %v2711_v29 = vld [vmem:[%s3933_s1 + $0x20] sm:$0xff]  ;;  %v2716_v54 = vld [vmem:[%s3933_s1 + $0x48] sm:$0xff] }
  0x10   : > { %274 = vadd.xlane.f32.xlu0 %v273_v3  ;;  %280 = vadd.xlane.f32.xlu1 %v279_v4  ;;  %v2723_v40 = vld [vmem:[%s3936_s4 + $0x4] ss:$0 sm:$0xff]  ;;  %v2724_v42 = vld [vmem:[%s3936_s4 + $0x5] ss:$0 sm:$0xff]  ;;  %v2729_v57 = vld [vmem:[%s3936_s4 + $0x1] ss:$0 sm:$0xff] }
  0x11   : > { %2957 = vmatprep.subr.mxu0 %v3319_v23  ;;  %2974 = vmatprep.subr.mxu1 %v3319_v23  ;;  %v2715_v56 = vld [vmem:[%s3933_s1 + $0x40] sm:$0xff] }
  0x12   : > { %2958 = vmatpush3.msra.mxu0 %v232_v26  ;;  %2975 = vmatpush3.msra.mxu1 %v2712_v27  ;;  %v2725_v60 = vld [vmem:[%s3936_s4] ss:$0 sm:$0xff] }
  0x13   : > { %2959 = vmatprep.subr.mxu0 %v3319_v23  ;;  %2976 = vmatprep.subr.mxu1 %v3319_v23 }
  0x14   : > { %277 = vadd.xlane.f32.xlu0 %v276_v5  ;;  %2960 = vmatpush3.msra.mxu0 %v231_v28 }
  0x15   : > { %2961 = vmatprep.mubr.msk.f32.mxu0 %vm3320_vm1, %v3319_v23  ;;  %2977 = vmatpush3.msra.mxu1 %v2711_v29 }
  0x16   : > { %2978 = vmatprep.mubr.msk.f32.mxu1 %vm3320_vm1, %v3319_v23  ;;  %2987 = vmatprep.subr.mxu0 %v3319_v23 }
  0x17   : > { %3233 = vmatprep.subr.mxu1 %v3319_v23 }
  0x99   : > { %v275_v6 = vpop.xlane.xlu0 %274  ;;  %v281_v7 = vpop.xlane.xlu1 %280 }
  0x9a   : > { %v283_v8 = vmul.f32 0.03125, %v275_v6  ;;  %v285_v9 = vmul.f32 0.03125, %v281_v7 }
  0x9c   : > { %v286_v10 = vsub.f32 %v3367_v0, %v283_v8  ;;  %v3381_v11 = vsub.f32 %v3369_v1, %v285_v9 }
  0x9d   : > { %v278_v12 = vpop.xlane.xlu0 %277 }
  0x9e   : > { %v284_v13 = vmul.f32 0.03125, %v278_v12  ;;  %v289_v14 = vmul.f32 %v286_v10, %v286_v10  ;;  %v291_v15 = vmul.f32 %v3381_v11, %v3381_v11 }
  0xa0   : > { %v287_v16 = vsub.f32 %v3371_v2, %v284_v13  ;;  %v292_v17 = vsel %vm272_vm0, %v289_v14, 0.0  ;;  %v298_v18 = vsel %vm272_vm0, %v291_v15, 0.0  ;;  %v2733_v15 = vld [vmem:[%s3936_s4 + $0x2] ss:$0 sm:$0xff] }
  0xa1   : > { %293 = vadd.xlane.f32.xlu1 %v292_v17 }
  0xa2   : > { %v290_v19 = vmul.f32 %v287_v16, %v287_v16 }
  0xa4   : > { %v295_v20 = vsel %vm272_vm0, %v290_v19, 0.0 }
  0xa5   : > { %299 = vadd.xlane.f32.xlu1 %v298_v18  ;;  %296 = vadd.xlane.f32.xlu0 %v295_v20 }
 0x12a   : > { %v294_v30 = vpop.xlane.xlu1 %293 }
 0x12b   : > { %v301_v31 = vmul.f32 0.03125, %v294_v30 }
 0x12d   : > { %v304_v32 = vadd.f32 1e-12, %v301_v31 }
 0x12e   : > { %v300_v33 = vpop.xlane.xlu1 %299  ;;  %v297_v34 = vpop.xlane.xlu0 %296 }
 0x12f   : > { %3251 = vrsqrt.f32 %v304_v32  ;;  %v303_v35 = vmul.f32 0.03125, %v300_v33  ;;  %v302_v36 = vmul.f32 0.03125, %v297_v34 }
 0x131   : > { %v306_v37 = vadd.f32 1e-12, %v303_v35  ;;  %v305_v38 = vadd.f32 1e-12, %v302_v36 }
 0x133   : > { %3253 = vrsqrt.f32 %v306_v37 }
 0x134   : > { %3255 = vrsqrt.f32 %v305_v38 }
 0x13c   : > { %v3252_v39 = vpop.eup %3251 }
 0x13d   : > { %v310_v41 = vmul.f32 %v3252_v39, %v286_v10 }
 0x13f   : > { %v317_v43 = vmul.f32 %v2723_v40, %v310_v41 }
 0x140   : > { %v3254_v44 = vpop.eup %3253 }
 0x141   : > { %v3256_v45 = vpop.eup %3255  ;;  %v324_v46 = vadd.f32 %v2724_v42, %v317_v43  ;;  %v312_v49 = vmul.f32 %v3254_v44, %v3381_v11 }
 0x142   : > { %v311_v47 = vmul.f32 %v3256_v45, %v287_v16 }
 0x143   : > { %2962 = vmatmul.mubr.msk.f32.vlgmr.msra.gmra.mxu0 %vm272_vm0, %v324_v46  ;;  %2979 = vmatmul.mubr.msk.f32.vlgmr.msra.gmra.mxu1 %vm272_vm0, %v324_v46  ;;  %v319_v53 = vmul.f32 %v2723_v40, %v312_v49 }
 0x144   : > { %2964 = vmatprep.mubr.msk.f32.mxu0 %vm3320_vm1, %v3319_v23  ;;  %2981 = vmatprep.mubr.msk.f32.mxu1 %vm3320_vm1, %v3319_v23  ;;  %v318_v50 = vmul.f32 %v2723_v40, %v311_v47 }
 0x145   : > { %2988 = vmatpush3.msra.mxu0 %v2718_v48  ;;  %3237 = vmatpush3.msra.mxu1 %v2718_v48  ;;  %v326_v55 = vadd.f32 %v2724_v42, %v319_v53 }
 0x146   : > { %v325_v52 = vadd.f32 %v2724_v42, %v318_v50  ;;  %2989 = vmatprep.subr.mxu0 %v3319_v23  ;;  %3234 = vmatprep.subr.mxu1 %v3319_v23 }
 0x147   : > { %2990 = vmatpush3.msra.mxu0 %v2717_v51  ;;  %3238 = vmatpush3.msra.mxu1 %v2717_v51 }
 0x148   : > { %2965 = vmatmul.mubr.msk.f32.gmra.mxu0 %vm272_vm0, %v325_v52  ;;  %2982 = vmatmul.mubr.msk.f32.gmra.mxu1 %vm272_vm0, %v325_v52 }
 0x149   : > { %2967 = vmatprep.mubr.msk.f32.mxu0 %vm3320_vm1, %v3319_v23  ;;  %2984 = vmatprep.mubr.msk.f32.mxu1 %vm3320_vm1, %v3319_v23 }
 0x14a   : > { %2991 = vmatprep.subr.mxu0 %v3319_v23  ;;  %3235 = vmatprep.subr.mxu1 %v3319_v23 }
 0x14b   : > { %2992 = vmatpush3.msra.mxu0 %v2716_v54  ;;  %3239 = vmatpush3.msra.mxu1 %v2716_v54 }
 0x14c   : > { %2968 = vmatmul.mubr.msk.f32.gmra.mxu0 %vm272_vm0, %v326_v55  ;;  %2985 = vmatmul.mubr.msk.f32.gmra.mxu1 %vm272_vm0, %v326_v55 }
 0x14d   : > { %2993 = vmatprep.subr.mxu0 %v3319_v23  ;;  %3236 = vmatprep.subr.mxu1 %v3319_v23 }
 0x14e   : > { %2994 = vmatpush3.msra.mxu0 %v2715_v56  ;;  %3240 = vmatpush3.msra.mxu1 %v2715_v56 }
 0x14f   : > { %2995 = vmatprep.mubr.msk.f32.mxu0 %vm3320_vm1, %v3319_v23  ;;  %2998 = vmatprep.mubr.msk.f32.mxu1 %vm3320_vm1, %v3319_v23 }
 0x150   : > { %2996 = vmatmul.mubr.msk.f32.vlgmr.msra.gmra.mxu0 %vm272_vm0, %v324_v46  ;;  %2999 = vmatmul.mubr.msk.f32.vlgmr.msra.gmra.mxu1 %vm272_vm0, %v325_v52 }
 0x151   : > { %3001 = vmatprep.mubr.msk.f32.mxu1 %vm3320_vm1, %v3319_v23  ;;  %3004 = vmatprep.subr.mxu1 %v3319_v23 }
 0x152   : > { %3019 = vmatprep.subr.mxu0 %v3319_v23  ;;  %3021 = vmatprep.mubr.msk.f32.mxu0 %vm3320_vm1, %v3319_v23 }
 0x154   : > { %3002 = vmatmul.mubr.msk.f32.gmra.mxu1 %vm272_vm0, %v326_v55 }
 0x155   : > { %3006 = vmatprep.mubr.msk.f32.mxu1 %vm3320_vm1, %v3319_v23 }
 0x203   : > { %v406_v58 = vpop.f32.mrf.mxu0  ;;  %v490_v59 = vpop.f32.mrf.mxu1 }
 0x204   : > { %v491_v61 = vadd.f32 %v2729_v57, %v490_v59  ;;  %v407_v3 = vadd.f32 %v2725_v60, %v406_v58 }
 0x205   : > { %v2963_v62 = vpop.f32.mrf.mxu0  ;;  %v2980_v63 = vpop.f32.mrf.mxu1 }
 0x206   : > { %3005 = vmatpush3.xpose.msk.msra.mxu1 %vm272_vm0, %v491_v61  ;;  %v2722_v61 = vld [vmem:[%s3933_s1 + $0x78] sm:$0xff]  ;;  %v2721_v62 = vld [vmem:[%s3933_s1 + $0x70] sm:$0xff] }
 0x207   : > { %3009 = vmatprep.subr.mxu1 %v3319_v23 }
 0x208   : > { %v411_v4 = vpop.f32.mrf.mxu0  ;;  %v495_v5 = vpop.f32.mrf.mxu1 }
 0x209   : > { %v496_v6 = vadd.f32 %v2729_v57, %v495_v5  ;;  %3007 = vmatmul.mubr.msk.f32.vlgmr.msra.gmra.mxu1 %vm272_vm0, %v407_v3  ;;  %v412_v9 = vadd.f32 %v2725_v60, %v411_v4  ;;  %v2720_v4 = vld [vmem:[%s3933_s1 + $0x68] sm:$0xff]  ;;  %v2719_v5 = vld [vmem:[%s3933_s1 + $0x60] sm:$0xff] }
 0x20a   : > { %v2966_v7 = vpop.f32.mrf.mxu0  ;;  %v2983_v8 = vpop.f32.mrf.mxu1  ;;  %3011 = vmatprep.mubr.msk.f32.mxu1 %vm3320_vm1, %v3319_v23 }
 0x20b   : > { %3010 = vmatpush3.xpose.msk.msra.mxu1 %vm272_vm0, %v496_v6 }
 0x20c   : > { %v416_v10 = vpop.f32.mrf.mxu0  ;;  %v500_v11 = vpop.f32.mrf.mxu1  ;;  %3014 = vmatprep.subr.mxu1 %v3319_v23 }
 0x20d   : > { %v501_v12 = vadd.f32 %v2729_v57, %v500_v11  ;;  %v417_v16 = vadd.f32 %v2725_v60, %v416_v10 }
 0x20e   : > { %v2969_v13 = vpop.f32.mrf.mxu0  ;;  %v2986_v14 = vpop.f32.mrf.mxu1  ;;  %3012 = vmatmul.mubr.msk.f32.vlgmr.msra.gmra.mxu1 %vm272_vm0, %v412_v9 }
 0x20f   : > { %3015 = vmatpush3.xpose.msk.msra.mxu1 %vm272_vm0, %v501_v12  ;;  %3016 = vmatprep.mubr.msk.f32.mxu1 %vm3320_vm1, %v3319_v23  ;;  %v2746_v12 = vld [vmem:[%s3936_s4 + $0x3] ss:$0 sm:$0xff] }
 0x210   : > { %v574_v17 = vpop.f32.mrf.mxu0  ;;  %v579_v18 = vpop.f32.mrf.mxu1  ;;  %3024 = vmatprep.subr.mxu1 %v3319_v23 }
 0x211   : > { %v575_v19 = vadd.f32 %v2733_v15, %v574_v17  ;;  %v580_v20 = vadd.f32 %v2733_v15, %v579_v18 }
 0x212   : > { %v2997_v21 = vpop.f32.mrf.mxu0  ;;  %v3000_v22 = vpop.f32.mrf.mxu1  ;;  %3017 = vmatmul.mubr.msk.f32.vlgmr.msra.gmra.mxu1 %vm272_vm0, %v417_v16 }
 0x213   : > { %3020 = vmatpush3.msra.mxu0 %v575_v19  ;;  %3025 = vmatpush3.msra.mxu1 %v580_v20 }
 0x214   : > { %v584_v24 = vpop.f32.mrf.mxu1  ;;  %3029 = vmatprep.subr.mxu0 %v3319_v23  ;;  %3026 = vmatprep.mubr.msk.f32.mxu1 %vm3320_vm1, %v3319_v23 }
 0x215   : > { %v585_v25 = vadd.f32 %v2733_v15, %v584_v24  ;;  %3034 = vmatprep.subr.mxu1 %v3319_v23 }
 0x216   : > { %v3003_v26 = vpop.f32.mrf.mxu1 }
 0x2c9   : > { %v660_v27 = vpop.f32.mrf.mxu1 }
 0x2ca   : > { %v816_v28 = vmul.f32 0.17677669, %v660_v27 }
 0x2cb   : > { %v3008_v29 = vpop.f32.mrf.mxu1 }
 0x2cc   : > { %v820_v30 = vsel %vm819_vm2, %v816_v28, -inf }
 0x2cd   : > { %821 = vmax.xlane.f32.xlu0 %v820_v30 }
 0x2ce   : > { %v736_v31 = vpop.f32.mrf.mxu1 }
 0x2cf   : > { %v817_v32 = vmul.f32 0.17677669, %v736_v31 }
 0x2d0   : > { %v3013_v33 = vpop.f32.mrf.mxu1 }
 0x2d1   : > { %v823_v34 = vsel %vm819_vm2, %v817_v32, -inf }
 0x2d2   : > { %824 = vmax.xlane.f32.xlu1 %v823_v34  ;;  %v812_v35 = vpop.f32.mrf.mxu1 }
 0x2d3   : > { %v818_v36 = vmul.f32 0.17677669, %v812_v35 }
 0x2d4   : > { %v3018_v37 = vpop.f32.mrf.mxu1 }
 0x2d5   : > { %v826_v38 = vsel %vm819_vm2, %v818_v36, -inf }
 0x2d6   : > { %827 = vmax.xlane.f32.xlu0 %v826_v38 }
 0x356   : > { %v822_v39 = vpop.xlane.xlu0 %821 }
 0x357   : > { %v829_v40 = vsub.f32 %v816_v28, %v822_v39 }
 0x359   : > { %v832_v41 = vmul.f32 1.442695, %v829_v40 }
 0x35b   : > { %3257 = vpow2.f32 %v832_v41  ;;  %v825_v42 = vpop.xlane.xlu1 %824  ;;  %v253_v41 = vld [vmem:[%s3934_s2 + $0x18] sm:$0xff] }
 0x35c   : > { %v830_v43 = vsub.f32 %v817_v32, %v825_v42  ;;  %v252_v42 = vld [vmem:[%s3934_s2 + $0x10] sm:$0xff] }
 0x35e   : > { %v834_v44 = vmul.f32 1.442695, %v830_v43  ;;  %v251_v43 = vld [vmem:[%s3934_s2 + $0x8] sm:$0xff] }
 0x35f   : > { %v828_v45 = vpop.xlane.xlu0 %827 }
 0x360   : > { %3259 = vpow2.f32 %v834_v44  ;;  %v831_v46 = vsub.f32 %v818_v36, %v828_v45  ;;  %v250_v44 = vld [vmem:[%s3934_s2] sm:$0xff] }
 0x362   : > { %v836_v47 = vmul.f32 1.442695, %v831_v46 }
 0x364   : > { %3261 = vpow2.f32 %v836_v47 }
 0x368   : > { %v3258_v48 = vpop.eup %3257 }
 0x369   : > { %v838_v49 = vsel %vm819_vm2, %v3258_v48, 0.0 }
 0x36a   : > { %839 = vadd.xlane.f32.xlu1 %v838_v49 }
 0x36d   : > { %v3260_v50 = vpop.eup %3259 }
 0x36e   : > { %v841_v51 = vsel %vm819_vm2, %v3260_v50, 0.0 }
 0x36f   : > { %842 = vadd.xlane.f32.xlu0 %v841_v51 }
 0x371   : > { %v3262_v52 = vpop.eup %3261 }
 0x372   : > { %v844_v53 = vsel %vm819_vm2, %v3262_v52, 0.0 }
 0x373   : > { %845 = vadd.xlane.f32.xlu1 %v844_v53 }
 0x3f3   : > { %v840_v54 = vpop.xlane.xlu1 %839 }
 0x3f4   : > { %3263 = vrcp.f32 %v840_v54 }
 0x3f8   : > { %v843_v55 = vpop.xlane.xlu0 %842 }
 0x3f9   : > { %3265 = vrcp.f32 %v843_v55  ;;  %v2750_v55 = vld [vmem:[%s3936_s4 + $0x8] ss:$0 sm:$0xff] }
 0x3fc   : > { %v846_v56 = vpop.xlane.xlu1 %845 }
 0x3fd   : > { %3267 = vrcp.f32 %v846_v56 }
 0x401   : > { %v3264_v57 = vpop.eup %3263 }
 0x402   : > { %v850_v58 = vmul.f32 %v3264_v57, %v3258_v48  ;;  %v2751_v57 = vld [vmem:[%s3936_s4 + $0x9] ss:$0 sm:$0xff] }
 0x404   : > { %3022 = vmatmul.mubr.msk.f32.vlgmr.msra.gmra.mxu0 %vm819_vm2, %v850_v58 }
 0x405   : > { %3030 = vmatpush3.msra.mxu0 %v585_v25  ;;  %3031 = vmatprep.mubr.msk.f32.mxu0 %vm3320_vm1, %v3319_v23 }
 0x406   : > { %v3266_v59 = vpop.eup %3265  ;;  %3051 = vmatprep.subr.mxu0 %v3319_v23 }
 0x407   : > { %v851_v60 = vmul.f32 %v3266_v59, %v3260_v50 }
 0x409   : > { %3027 = vmatmul.mubr.msk.f32.vlgmr.msra.gmra.mxu1 %vm819_vm2, %v851_v60 }
 0x40a   : > { %v3268_v63 = vpop.eup %3267  ;;  %3035 = vmatpush3.msra.mxu1 %v2722_v61  ;;  %3042 = vmatprep.mubr.msk.f32.mxu1 %vm3320_vm1, %v3319_v23 }
 0x40b   : > { %v852_v3 = vmul.f32 %v3268_v63, %v3262_v52  ;;  %3036 = vmatprep.subr.mxu1 %v3319_v23 }
 0x40c   : > { %3037 = vmatpush3.msra.mxu1 %v2721_v62 }
 0x40d   : > { %3032 = vmatmul.mubr.msk.f32.vlgmr.msra.gmra.mxu0 %vm819_vm2, %v852_v3  ;;  %3038 = vmatprep.subr.mxu1 %v3319_v23 }
 0x40e   : > { %3039 = vmatpush3.msra.mxu1 %v2720_v4  ;;  %3059 = vmatprep.mubr.msk.f32.mxu0 %vm3320_vm1, %v3319_v23 }
 0x40f   : > { %3040 = vmatprep.subr.mxu1 %v3319_v23  ;;  %3052 = vmatpush3.msra.mxu0 %v253_v41 }
 0x410   : > { %3041 = vmatpush3.msra.mxu1 %v2719_v5  ;;  %3053 = vmatprep.subr.mxu0 %v3319_v23 }
 0x411   : > { %3068 = vmatprep.subr.mxu1 %v3319_v23  ;;  %3054 = vmatpush3.msra.mxu0 %v252_v42 }
 0x412   : > { %3055 = vmatprep.subr.mxu0 %v3319_v23 }
 0x413   : > { %3056 = vmatpush3.msra.mxu0 %v251_v43 }
 0x414   : > { %3057 = vmatprep.subr.mxu0 %v3319_v23 }
 0x415   : > { %3058 = vmatpush3.msra.mxu0 %v250_v44 }
 0x416   : > { %3093 = vmatprep.subr.mxu0 %v3319_v23 }
 0x4c4   : > { %v922_v6 = vpop.f32.mrf.mxu0 }
 0x4c5   : > { %3043 = vmatmul.mubr.msk.f32.vlgmr.msra.gmra.mxu1 %vm272_vm0, %v922_v6 }
 0x4c6   : > { %v3023_v7 = vpop.f32.mrf.mxu0  ;;  %3045 = vmatprep.mubr.msk.f32.mxu1 %vm3320_vm1, %v3319_v23 }
 0x4c7   : > { %v261_v7 = vld [vmem:[%s3935_s3 + $0x38] sm:$0xff] }
 0x4c8   : > { %3069 = vmatpush3.msra.mxu1 %v261_v7 }
 0x4c9   : > { %v995_v8 = vpop.f32.mrf.mxu1  ;;  %3070 = vmatprep.subr.mxu1 %v3319_v23 }
 0x4ca   : > { %3046 = vmatmul.mubr.msk.f32.gmra.mxu1 %vm272_vm0, %v995_v8  ;;  %v260_v8 = vld [vmem:[%s3935_s3 + $0x30] sm:$0xff] }
 0x4cb   : > { %v3028_v9 = vpop.f32.mrf.mxu1  ;;  %3048 = vmatprep.mubr.msk.f32.mxu1 %vm3320_vm1, %v3319_v23  ;;  %3071 = vmatpush3.msra.mxu1 %v260_v8 }
 0x4cc   : > { %3072 = vmatprep.subr.mxu1 %v3319_v23  ;;  %v259_v9 = vld [vmem:[%s3935_s3 + $0x28] sm:$0xff] }
 0x4cd   : > { %v1068_v10 = vpop.f32.mrf.mxu0  ;;  %3073 = vmatpush3.msra.mxu1 %v259_v9 }
 0x4ce   : > { %3049 = vmatmul.mubr.msk.f32.gmra.mxu1 %vm272_vm0, %v1068_v10  ;;  %3074 = vmatprep.subr.mxu1 %v3319_v23  ;;  %v258_v10 = vld [vmem:[%s3935_s3 + $0x20] sm:$0xff] }
 0x4cf   : > { %v3033_v11 = vpop.f32.mrf.mxu0  ;;  %3084 = vmatprep.mubr.msk.f32.mxu1 %vm3320_vm1, %v3319_v23  ;;  %3075 = vmatpush3.msra.mxu1 %v258_v10 }
 0x4d0   : > { %3076 = vmatprep.subr.mxu1 %v3319_v23  ;;  %v257_v11 = vld [vmem:[%s3935_s3 + $0x18] sm:$0xff] }
 0x4d1   : > { %3077 = vmatpush3.msra.mxu1 %v257_v11 }
 0x4d2   : > { %3078 = vmatprep.subr.mxu1 %v3319_v23 }
 0x585   : > { %v1151_v13 = vpop.f32.mrf.mxu1 }
 0x586   : > { %v1152_v14 = vadd.f32 %v2746_v12, %v1151_v13  ;;  %v255_v13 = vld [vmem:[%s3935_s3 + $0x8] sm:$0xff] }
 0x587   : > { %v3044_v15 = vpop.f32.mrf.mxu1 }
 0x588   : > { %v3552_v16 = vadd.f32 %v1152_v14, %v3367_v0  ;;  %v254_v14 = vld [vmem:[%s3935_s3] sm:$0xff] }
 0x589   : > { %v2752_v15 = vld [vmem:[%s3936_s4 + $0x6] ss:$0 sm:$0xff] }
 0x58a   : > { %v1156_v17 = vpop.f32.mrf.mxu1  ;;  %v1168_v18 = vsel %vm272_vm0, %v3552_v16, 0.0 }
 0x58b   : > { %v1157_v19 = vadd.f32 %v2746_v12, %v1156_v17  ;;  %1169 = vadd.xlane.f32.xlu0 %v1168_v18 }
 0x58c   : > { %v3047_v20 = vpop.f32.mrf.mxu1 }
 0x58d   : > { %v3557_v21 = vadd.f32 %v1157_v19, %v3371_v2 }
 0x58e   : > { %v1161_v22 = vpop.f32.mrf.mxu1 }
 0x58f   : > { %v1162_v24 = vadd.f32 %v2746_v12, %v1161_v22  ;;  %v1171_v25 = vsel %vm272_vm0, %v3557_v21, 0.0  ;;  %v256_v12 = vld [vmem:[%s3935_s3 + $0x10] sm:$0xff] }
 0x590   : > { %1172 = vadd.xlane.f32.xlu1 %v1171_v25  ;;  %v3050_v26 = vpop.f32.mrf.mxu1  ;;  %3079 = vmatpush3.msra.mxu1 %v256_v12 }
 0x591   : > { %v3562_v0 = vadd.f32 %v1162_v24, %v3369_v1  ;;  %3080 = vmatprep.subr.mxu1 %v3319_v23 }
 0x592   : > { %3081 = vmatpush3.msra.mxu1 %v255_v13 }
 0x593   : > { %v1174_v27 = vsel %vm272_vm0, %v3562_v0, 0.0  ;;  %3082 = vmatprep.subr.mxu1 %v3319_v23 }
 0x594   : > { %1175 = vadd.xlane.f32.xlu0 %v1174_v27  ;;  %3083 = vmatpush3.msra.mxu1 %v254_v14 }
 0x595   : > { %3127 = vmatprep.subr.mxu1 %v3319_v23 }
 0x614   : > { %v1170_v28 = vpop.xlane.xlu0 %1169 }
 0x615   : > { %v1177_v29 = vmul.f32 0.03125, %v1170_v28 }
 0x617   : > { %v1180_v30 = vsub.f32 %v3552_v16, %v1177_v29 }
 0x619   : > { %v1173_v2 = vpop.xlane.xlu1 %1172  ;;  %v1183_v31 = vmul.f32 %v1180_v30, %v1180_v30 }
 0x61a   : > { %v1178_v32 = vmul.f32 0.03125, %v1173_v2 }
 0x61b   : > { %v1186_v33 = vsel %vm272_vm0, %v1183_v31, 0.0 }
 0x61c   : > { %v1181_v34 = vsub.f32 %v3557_v21, %v1178_v32  ;;  %1187 = vadd.xlane.f32.xlu1 %v1186_v33 }
 0x61d   : > { %v1176_v35 = vpop.xlane.xlu0 %1175 }
 0x61e   : > { %v1179_v36 = vmul.f32 0.03125, %v1176_v35  ;;  %v1184_v1 = vmul.f32 %v1181_v34, %v1181_v34 }
 0x620   : > { %v1182_v37 = vsub.f32 %v3562_v0, %v1179_v36  ;;  %v1189_v38 = vsel %vm272_vm0, %v1184_v1, 0.0 }
 0x621   : > { %1190 = vadd.xlane.f32.xlu0 %v1189_v38 }
 0x622   : > { %v1185_v39 = vmul.f32 %v1182_v37, %v1182_v37 }
 0x624   : > { %v1192_v40 = vsel %vm272_vm0, %v1185_v39, 0.0 }
 0x625   : > { %1193 = vadd.xlane.f32.xlu1 %v1192_v40 }
 0x6a5   : > { %v1188_v45 = vpop.xlane.xlu1 %1187 }
 0x6a6   : > { %v1195_v46 = vmul.f32 0.03125, %v1188_v45 }
 0x6a8   : > { %v1198_v47 = vadd.f32 1e-12, %v1195_v46 }
 0x6aa   : > { %3269 = vrsqrt.f32 %v1198_v47  ;;  %v1191_v48 = vpop.xlane.xlu0 %1190 }
 0x6ab   : > { %v1196_v49 = vmul.f32 0.03125, %v1191_v48 }
 0x6ad   : > { %v1199_v50 = vadd.f32 1e-12, %v1196_v49 }
 0x6ae   : > { %v1194_v51 = vpop.xlane.xlu1 %1193 }
 0x6af   : > { %3271 = vrsqrt.f32 %v1199_v50  ;;  %v1197_v52 = vmul.f32 0.03125, %v1194_v51 }
 0x6b1   : > { %v1200_v53 = vadd.f32 1e-12, %v1197_v52 }
 0x6b3   : > { %3273 = vrsqrt.f32 %v1200_v53  ;;  %v2756_v53 = vld [vmem:[%s3936_s4 + $0x7] ss:$0 sm:$0xff] }
 0x6b7   : > { %v3270_v54 = vpop.eup %3269 }
 0x6b8   : > { %v1204_v56 = vmul.f32 %v3270_v54, %v1180_v30 }
 0x6ba   : > { %v1211_v58 = vmul.f32 %v2750_v55, %v1204_v56 }
 0x6bc   : > { %v3272_v59 = vpop.eup %3271  ;;  %v1218_v60 = vadd.f32 %v2751_v57, %v1211_v58 }
 0x6bd   : > { %v1205_v61 = vmul.f32 %v3272_v59, %v1181_v34 }
 0x6be   : > { %3060 = vmatmul.mubr.msk.f32.vlgmr.msra.gmra.mxu0 %vm272_vm0, %v1218_v60 }
 0x6bf   : > { %3062 = vmatprep.mubr.msk.f32.mxu0 %vm3320_vm1, %v3319_v23  ;;  %v1212_v62 = vmul.f32 %v2750_v55, %v1205_v61 }
 0x6c0   : > { %v3274_v63 = vpop.eup %3273 }
 0x6c1   : > { %v1219_v3 = vadd.f32 %v2751_v57, %v1212_v62  ;;  %v1206_v4 = vmul.f32 %v3274_v63, %v1182_v37 }
 0x6c3   : > { %3063 = vmatmul.mubr.msk.f32.gmra.mxu0 %vm272_vm0, %v1219_v3  ;;  %v1213_v5 = vmul.f32 %v2750_v55, %v1206_v4 }
 0x6c4   : > { %3065 = vmatprep.mubr.msk.f32.mxu0 %vm3320_vm1, %v3319_v23 }
 0x6c5   : > { %v1220_v6 = vadd.f32 %v2751_v57, %v1213_v5 }
 0x6c7   : > { %3066 = vmatmul.mubr.msk.f32.gmra.mxu0 %vm272_vm0, %v1220_v6 }
 0x6c8   : > { %3101 = vmatprep.mubr.msk.f32.mxu0 %vm3320_vm1, %v3319_v23 }
 0x77e   : > { %v1300_v17 = vpop.f32.mrf.mxu0 }
 0x77f   : > { %v1301_v18 = vadd.f32 %v2752_v15, %v1300_v17 }
 0x780   : > { %v3061_v19 = vpop.f32.mrf.mxu0 }
 0x781   : > { %v1314_v20 = vmul.f32 %v1301_v18, %v1301_v18 }
 0x783   : > { %v1317_v22 = vmul.f32 %v1314_v20, %v1301_v18  ;;  %v1305_v24 = vpop.f32.mrf.mxu0 }
 0x784   : > { %v1306_v25 = vadd.f32 %v2752_v15, %v1305_v24  ;;  %v2771_v24 = vld [vmem:[%s3933_s1 + $0xd8] sm:$0xff] }
 0x785   : > { %v1320_v26 = vmul.f32 0.044715, %v1317_v22  ;;  %v3064_v27 = vpop.f32.mrf.mxu0  ;;  %v2763_v22 = vld [vmem:[%s3933_s1 + $0x98] sm:$0xff] }
 0x786   : > { %v1315_v28 = vmul.f32 %v1306_v25, %v1306_v25  ;;  %3094 = vmatpush3.msra.mxu0 %v2763_v22  ;;  %v2761_v27 = vld [vmem:[%s3933_s1 + $0x88] sm:$0xff] }
 0x787   : > { %v1323_v29 = vadd.f32 %v1320_v26, %v1301_v18  ;;  %v1310_v30 = vpop.f32.mrf.mxu0  ;;  %3095 = vmatprep.subr.mxu0 %v3319_v23  ;;  %v2770_v26 = vld [vmem:[%s3933_s1 + $0xd0] sm:$0xff] }
 0x788   : > { %v1318_v2 = vmul.f32 %v1315_v28, %v1306_v25  ;;  %v1311_v31 = vadd.f32 %v2752_v15, %v1310_v30  ;;  %v2769_v28 = vld [vmem:[%s3933_s1 + $0xc8] sm:$0xff]  ;;  %v2768_v30 = vld [vmem:[%s3933_s1 + $0xc0] sm:$0xff] }
 0x789   : > { %v1326_v32 = vmul.f32 0.7978846, %v1323_v29  ;;  %v3067_v33 = vpop.f32.mrf.mxu0  ;;  %v2760_v29 = vld [vmem:[%s3933_s1 + $0x80] sm:$0xff] }
 0x78a   : > { %v1321_v34 = vmul.f32 0.044715, %v1318_v2  ;;  %v1316_v35 = vmul.f32 %v1311_v31, %v1311_v31 }
 0x78b   : > { %3275 = vtanh.f32 %v1326_v32 }
 0x78c   : > { %v1324_v36 = vadd.f32 %v1321_v34, %v1306_v25  ;;  %v1319_v1 = vmul.f32 %v1316_v35, %v1311_v31 }
 0x78e   : > { %v1327_v37 = vmul.f32 0.7978846, %v1324_v36  ;;  %v1322_v38 = vmul.f32 0.044715, %v1319_v1 }
 0x790   : > { %3277 = vtanh.f32 %v1327_v37  ;;  %v1325_v39 = vadd.f32 %v1322_v38, %v1311_v31 }
 0x792   : > { %v1328_v40 = vmul.f32 0.7978846, %v1325_v39  ;;  %v2798_v39 = vld [vmem:[%s3936_s4 + $0x14] ss:$0 sm:$0xff] }
 0x794   : > { %3279 = vtanh.f32 %v1328_v40 }
 0x798   : > { %v3276_v41 = vpop.eup %3275 }
 0x799   : > { %v1332_v42 = vadd.f32 1.0, %v3276_v41  ;;  %v2799_v41 = vld [vmem:[%s3936_s4 + $0x15] ss:$0 sm:$0xff] }
 0x79b   : > { %v1335_v43 = vmul.f32 0.5, %v1332_v42 }
 0x79d   : > { %v3278_v44 = vpop.eup %3277  ;;  %v1338_v45 = vmul.f32 %v1335_v43, %v1301_v18 }
 0x79e   : > { %v1333_v46 = vadd.f32 1.0, %v3278_v44 }
 0x79f   : > { %3085 = vmatmul.mubr.msk.f32.vlgmr.msra.gmra.mxu1 %vm1345_vm3, %v1338_v45 }
 0x7a0   : > { %3087 = vmatprep.mubr.msk.f32.mxu1 %vm3320_vm1, %v3319_v23  ;;  %v1336_v47 = vmul.f32 0.5, %v1333_v46  ;;  %3128 = vmatpush3.msra.mxu1 %v2771_v24  ;;  %v2767_v46 = vld [vmem:[%s3933_s1 + $0xb8] sm:$0xff] }
 0x7a1   : > { %v3280_v48 = vpop.eup %3279  ;;  %3129 = vmatprep.subr.mxu1 %v3319_v23 }
 0x7a2   : > { %v1339_v49 = vmul.f32 %v1336_v47, %v1306_v25  ;;  %v1334_v50 = vadd.f32 1.0, %v3280_v48  ;;  %v2762_v25 = vld [vmem:[%s3933_s1 + $0x90] sm:$0xff]  ;;  %3130 = vmatpush3.msra.mxu1 %v2770_v26 }
 0x7a3   : > { %3096 = vmatpush3.msra.mxu0 %v2762_v25  ;;  %3131 = vmatprep.subr.mxu1 %v3319_v23  ;;  %v2766_v48 = vld [vmem:[%s3933_s1 + $0xb0] sm:$0xff] }
 0x7a4   : > { %3088 = vmatmul.mubr.msk.f32.gmra.mxu1 %vm1345_vm3, %v1339_v49  ;;  %v1337_v51 = vmul.f32 0.5, %v1334_v50  ;;  %3097 = vmatprep.subr.mxu0 %v3319_v23 }
 0x7a5   : > { %3090 = vmatprep.mubr.msk.f32.mxu1 %vm3320_vm1, %v3319_v23  ;;  %3098 = vmatpush3.msra.mxu0 %v2761_v27 }
 0x7a6   : > { %v1340_v52 = vmul.f32 %v1337_v51, %v1311_v31  ;;  %3132 = vmatpush3.msra.mxu1 %v2769_v28  ;;  %3099 = vmatprep.subr.mxu0 %v3319_v23 }
 0x7a7   : > { %3133 = vmatprep.subr.mxu1 %v3319_v23  ;;  %3100 = vmatpush3.msra.mxu0 %v2760_v29 }
 0x7a8   : > { %3091 = vmatmul.mubr.msk.f32.gmra.mxu1 %vm1345_vm3, %v1340_v52  ;;  %3110 = vmatprep.subr.mxu0 %v3319_v23 }
 0x7a9   : > { %3135 = vmatprep.mubr.msk.f32.mxu1 %vm3320_vm1, %v3319_v23  ;;  %3134 = vmatpush3.msra.mxu1 %v2768_v30 }
 0x7aa   : > { %3149 = vmatprep.subr.mxu1 %v3319_v23 }
 0x85f   : > { %v1421_v54 = vpop.f32.mrf.mxu1 }
 0x860   : > { %v1422_v55 = vadd.f32 %v2756_v53, %v1421_v54 }
 0x861   : > { %v3086_v56 = vpop.f32.mrf.mxu1 }
 0x862   : > { %v3651_v57 = vadd.f32 %v1422_v55, %v3552_v16  ;;  %v2764_v55 = vld [vmem:[%s3933_s1 + $0xa0] sm:$0xff] }
 0x864   : > { %v1426_v58 = vpop.f32.mrf.mxu1  ;;  %v1483_v59 = vsel %vm272_vm0, %v3651_v57, 0.0 }
 0x865   : > { %v1427_v60 = vadd.f32 %v2756_v53, %v1426_v58  ;;  %1484 = vadd.xlane.f32.xlu0 %v1483_v59 }
 0x866   : > { %v3089_v61 = vpop.f32.mrf.mxu1 }
 0x867   : > { %v3656_v62 = vadd.f32 %v1427_v60, %v3557_v21 }
 0x868   : > { %v1431_v63 = vpop.f32.mrf.mxu1 }
 0x869   : > { %v1432_v3 = vadd.f32 %v2756_v53, %v1431_v63  ;;  %v1486_v4 = vsel %vm272_vm0, %v3656_v62, 0.0  ;;  %v2765_v53 = vld [vmem:[%s3933_s1 + $0xa8] sm:$0xff] }
 0x86a   : > { %1487 = vadd.xlane.f32.xlu1 %v1486_v4  ;;  %v3092_v5 = vpop.f32.mrf.mxu1 }
 0x86b   : > { %v3661_v16 = vadd.f32 %v1432_v3, %v3562_v0  ;;  %v2808_v5 = vld [vmem:[%s3936_s4 + $0x12] ss:$0 sm:$0xff] }
 0x86d   : > { %v1489_v6 = vsel %vm272_vm0, %v3661_v16, 0.0 }
 0x86e   : > { %1490 = vadd.xlane.f32.xlu0 %v1489_v6 }
 0x8ee   : > { %v1485_v7 = vpop.xlane.xlu0 %1484 }
 0x8ef   : > { %v1492_v8 = vmul.f32 0.03125, %v1485_v7 }
 0x8f1   : > { %v1495_v9 = vsub.f32 %v3651_v57, %v1492_v8 }
 0x8f3   : > { %v1488_v21 = vpop.xlane.xlu1 %1487  ;;  %v1498_v10 = vmul.f32 %v1495_v9, %v1495_v9 }
 0x8f4   : > { %v1493_v11 = vmul.f32 0.03125, %v1488_v21 }
 0x8f5   : > { %v1501_v12 = vsel %vm272_vm0, %v1498_v10, 0.0  ;;  %v2804_v10 = vld [vmem:[%s3936_s4 + $0x11] ss:$0 sm:$0xff] }
 0x8f6   : > { %v1496_v13 = vsub.f32 %v3656_v62, %v1493_v11  ;;  %1502 = vadd.xlane.f32.xlu1 %v1501_v12  ;;  %v2800_v12 = vld [vmem:[%s3936_s4 + $0x10] ss:$0 sm:$0xff] }
 0x8f7   : > { %v1491_v14 = vpop.xlane.xlu0 %1490 }
 0x8f8   : > { %v1494_v15 = vmul.f32 0.03125, %v1491_v14  ;;  %v1499_v0 = vmul.f32 %v1496_v13, %v1496_v13 }
 0x8fa   : > { %v1497_v17 = vsub.f32 %v3661_v16, %v1494_v15  ;;  %v1504_v18 = vsel %vm272_vm0, %v1499_v0, 0.0 }
 0x8fb   : > { %1505 = vadd.xlane.f32.xlu0 %v1504_v18 }
 0x8fc   : > { %v1500_v19 = vmul.f32 %v1497_v17, %v1497_v17 }
 0x8fe   : > { %v1507_v20 = vsel %vm272_vm0, %v1500_v19, 0.0 }
 0x8ff   : > { %1508 = vadd.xlane.f32.xlu1 %v1507_v20 }
 0x97f   : > { %v1503_v2 = vpop.xlane.xlu1 %1502 }
 0x980   : > { %v1510_v31 = vmul.f32 0.03125, %v1503_v2 }
 0x982   : > { %v1513_v32 = vadd.f32 1e-12, %v1510_v31 }
 0x984   : > { %3281 = vrsqrt.f32 %v1513_v32  ;;  %v1506_v33 = vpop.xlane.xlu0 %1505 }
 0x985   : > { %v1511_v34 = vmul.f32 0.03125, %v1506_v33 }
 0x987   : > { %v1514_v35 = vadd.f32 1e-12, %v1511_v34 }
 0x988   : > { %v1509_v36 = vpop.xlane.xlu1 %1508 }
 0x989   : > { %3283 = vrsqrt.f32 %v1514_v35  ;;  %v1512_v1 = vmul.f32 0.03125, %v1509_v36 }
 0x98b   : > { %v1515_v37 = vadd.f32 1e-12, %v1512_v1 }
 0x98d   : > { %3285 = vrsqrt.f32 %v1515_v37 }
 0x991   : > { %v3282_v38 = vpop.eup %3281 }
 0x992   : > { %v1519_v40 = vmul.f32 %v3282_v38, %v1495_v9 }
 0x994   : > { %v1526_v42 = vmul.f32 %v2798_v39, %v1519_v40 }
 0x996   : > { %v3284_v43 = vpop.eup %3283  ;;  %v1533_v44 = vadd.f32 %v2799_v41, %v1526_v42 }
 0x997   : > { %v1520_v45 = vmul.f32 %v3284_v43, %v1496_v13 }
 0x998   : > { %3102 = vmatmul.mubr.msk.f32.vlgmr.msra.gmra.mxu0 %vm272_vm0, %v1533_v44  ;;  %3136 = vmatmul.mubr.msk.f32.vlgmr.msra.gmra.mxu1 %vm272_vm0, %v1533_v44 }
 0x999   : > { %3104 = vmatprep.mubr.msk.f32.mxu0 %vm3320_vm1, %v3319_v23  ;;  %3138 = vmatprep.mubr.msk.f32.mxu1 %vm3320_vm1, %v3319_v23  ;;  %v1527_v47 = vmul.f32 %v2798_v39, %v1520_v45 }
 0x99a   : > { %v3286_v49 = vpop.eup %3285  ;;  %3111 = vmatpush3.msra.mxu0 %v2767_v46 }
 0x99b   : > { %v1534_v50 = vadd.f32 %v2799_v41, %v1527_v47  ;;  %3112 = vmatprep.subr.mxu0 %v3319_v23  ;;  %v1521_v51 = vmul.f32 %v3286_v49, %v1497_v17 }
 0x99c   : > { %3113 = vmatpush3.msra.mxu0 %v2766_v48 }
 0x99d   : > { %3105 = vmatmul.mubr.msk.f32.gmra.mxu0 %vm272_vm0, %v1534_v50  ;;  %3139 = vmatmul.mubr.msk.f32.gmra.mxu1 %vm272_vm0, %v1534_v50  ;;  %v1528_v52 = vmul.f32 %v2798_v39, %v1521_v51 }
 0x99e   : > { %3107 = vmatprep.mubr.msk.f32.mxu0 %vm3320_vm1, %v3319_v23  ;;  %3141 = vmatprep.mubr.msk.f32.mxu1 %vm3320_vm1, %v3319_v23 }
 0x99f   : > { %v1535_v54 = vadd.f32 %v2799_v41, %v1528_v52  ;;  %3114 = vmatprep.subr.mxu0 %v3319_v23 }
 0x9a0   : > { %3115 = vmatpush3.msra.mxu0 %v2765_v53 }
 0x9a1   : > { %3108 = vmatmul.mubr.msk.f32.gmra.mxu0 %vm272_vm0, %v1535_v54  ;;  %3142 = vmatmul.mubr.msk.f32.gmra.mxu1 %vm272_vm0, %v1535_v54 }
 0x9a2   : > { %3116 = vmatprep.subr.mxu0 %v3319_v23  ;;  %3118 = vmatprep.mubr.msk.f32.mxu0 %vm3320_vm1, %v3319_v23 }
 0x9a3   : > { %3117 = vmatpush3.msra.mxu0 %v2764_v55  ;;  %3151 = vmatprep.mubr.msk.f32.mxu1 %vm3320_vm1, %v3319_v23 }
 0x9a4   : > { %3144 = vmatprep.subr.mxu0 %v3319_v23 }
 0x9a5   : > { %3119 = vmatmul.mubr.msk.f32.vlgmr.msra.gmra.mxu0 %vm272_vm0, %v1533_v44 }
 0x9a6   : > { %3121 = vmatprep.mubr.msk.f32.mxu0 %vm3320_vm1, %v3319_v23 }
 0x9a9   : > { %3122 = vmatmul.mubr.msk.f32.gmra.mxu0 %vm272_vm0, %v1534_v50 }
 0x9aa   : > { %3124 = vmatprep.mubr.msk.f32.mxu0 %vm3320_vm1, %v3319_v23 }
 0x9ad   : > { %3125 = vmatmul.mubr.msk.f32.gmra.mxu0 %vm272_vm0, %v1535_v54 }
 0x9ae   : > { %3146 = vmatprep.mubr.msk.f32.mxu0 %vm3320_vm1, %v3319_v23 }
 0xa58   : > { %v1615_v56 = vpop.f32.mrf.mxu0  ;;  %v1783_v58 = vpop.f32.mrf.mxu1 }
 0xa59   : > { %v1616_v15 = vadd.f32 %v2800_v12, %v1615_v56  ;;  %v1784_v22 = vadd.f32 %v2808_v5, %v1783_v58 }
 0xa5a   : > { %v3103_v59 = vpop.f32.mrf.mxu0  ;;  %v3137_v60 = vpop.f32.mrf.mxu1 }
 0xa5d   : > { %v1620_v61 = vpop.f32.mrf.mxu0  ;;  %v1788_v63 = vpop.f32.mrf.mxu1 }
 0xa5e   : > { %v1621_v19 = vadd.f32 %v2800_v12, %v1620_v61  ;;  %v1789_v27 = vadd.f32 %v2808_v5, %v1788_v63  ;;  %v2775_v61 = vld [vmem:[%s3933_s1 + $0xf8] sm:$0xff]  ;;  %v2774_v63 = vld [vmem:[%s3933_s1 + $0xf0] sm:$0xff] }
 0xa5f   : > { %v3106_v3 = vpop.f32.mrf.mxu0  ;;  %v3140_v4 = vpop.f32.mrf.mxu1 }
 0xa61   : > { %v1625_v6 = vpop.f32.mrf.mxu0  ;;  %v1793_v7 = vpop.f32.mrf.mxu1 }
 0xa62   : > { %v3755_v8 = vadd.f32 %v2808_v5, %v1793_v7  ;;  %v1626_v26 = vadd.f32 %v2800_v12, %v1625_v6  ;;  %v2773_v5 = vld [vmem:[%s3933_s1 + $0xe8] sm:$0xff]  ;;  %v2772_v6 = vld [vmem:[%s3933_s1 + $0xe0] sm:$0xff]  ;;  %v2821_v12 = vld [vmem:[%s3936_s4 + $0x13] ss:$0 sm:$0xff] }
 0xa63   : > { %v3109_v9 = vpop.f32.mrf.mxu0  ;;  %v3143_v21 = vpop.f32.mrf.mxu1 }
 0xa65   : > { %v1699_v11 = vpop.f32.mrf.mxu0 }
 0xa66   : > { %v1700_v13 = vadd.f32 %v2804_v10, %v1699_v11 }
 0xa67   : > { %v3120_v14 = vpop.f32.mrf.mxu0 }
 0xa68   : > { %3145 = vmatpush3.xpose.msk.msra.mxu0 %vm272_vm0, %v1700_v13 }
 0xa69   : > { %v1704_v0 = vpop.f32.mrf.mxu0  ;;  %3154 = vmatprep.subr.mxu0 %v3319_v23 }
 0xa6a   : > { %v1705_v17 = vadd.f32 %v2804_v10, %v1704_v0 }
 0xa6b   : > { %v3123_v18 = vpop.f32.mrf.mxu0  ;;  %3147 = vmatmul.mubr.msk.f32.vlgmr.msra.gmra.mxu0 %vm272_vm0, %v1616_v15 }
 0xa6c   : > { %3150 = vmatpush3.xpose.msk.msra.mxu1 %vm272_vm0, %v1705_v17  ;;  %3156 = vmatprep.mubr.msk.f32.mxu0 %vm3320_vm1, %v3319_v23 }
 0xa6d   : > { %v1709_v20 = vpop.f32.mrf.mxu0  ;;  %3159 = vmatprep.subr.mxu1 %v3319_v23 }
 0xa6e   : > { %v1710_v24 = vadd.f32 %v2804_v10, %v1709_v20 }
 0xa6f   : > { %v3126_v25 = vpop.f32.mrf.mxu0  ;;  %3152 = vmatmul.mubr.msk.f32.vlgmr.msra.gmra.mxu1 %vm272_vm0, %v1621_v19 }
 0xa70   : > { %3155 = vmatpush3.xpose.msk.msra.mxu0 %vm272_vm0, %v1710_v24  ;;  %3160 = vmatpush3.msra.mxu1 %v1784_v22 }
 0xa71   : > { %3164 = vmatprep.subr.mxu0 %v3319_v23  ;;  %3161 = vmatprep.mubr.msk.f32.mxu1 %vm3320_vm1, %v3319_v23 }
 0xa72   : > { %3169 = vmatprep.subr.mxu1 %v3319_v23 }
 0xa73   : > { %3157 = vmatmul.mubr.msk.f32.vlgmr.msra.gmra.mxu0 %vm272_vm0, %v1626_v26 }
 0xa74   : > { %3165 = vmatpush3.msra.mxu0 %v1789_v27  ;;  %3166 = vmatprep.mubr.msk.f32.mxu0 %vm3320_vm1, %v3319_v23 }
 0xa75   : > { %3174 = vmatprep.subr.mxu0 %v3319_v23 }
 0xb2b   : > { %v1869_v28 = vpop.f32.mrf.mxu0 }
 0xb2c   : > { %v2025_v29 = vmul.f32 0.17677669, %v1869_v28 }
 0xb2d   : > { %v3148_v30 = vpop.f32.mrf.mxu0 }
 0xb2e   : > { %v2028_v2 = vsel %vm819_vm2, %v2025_v29, -inf }
 0xb2f   : > { %v1945_v31 = vpop.f32.mrf.mxu1  ;;  %2029 = vmax.xlane.f32.xlu0 %v2028_v2 }
 0xb30   : > { %v2026_v32 = vmul.f32 0.17677669, %v1945_v31 }
 0xb31   : > { %v3153_v33 = vpop.f32.mrf.mxu1 }
 0xb32   : > { %v2031_v34 = vsel %vm819_vm2, %v2026_v32, -inf }
 0xb33   : > { %2032 = vmax.xlane.f32.xlu1 %v2031_v34  ;;  %v2021_v35 = vpop.f32.mrf.mxu0 }
 0xb34   : > { %v2027_v36 = vmul.f32 0.17677669, %v2021_v35 }
 0xb35   : > { %v3158_v1 = vpop.f32.mrf.mxu0 }
 0xb36   : > { %v2034_v37 = vsel %vm819_vm2, %v2027_v36, -inf }
 0xb37   : > { %2035 = vmax.xlane.f32.xlu0 %v2034_v37 }
 0xbb8   : > { %v2030_v38 = vpop.xlane.xlu0 %2029 }
 0xbb9   : > { %v2037_v39 = vsub.f32 %v2025_v29, %v2030_v38 }
 0xbbb   : > { %v2040_v40 = vmul.f32 1.442695, %v2037_v39 }
 0xbbc   : > { %v2033_v41 = vpop.xlane.xlu1 %2032 }
 0xbbd   : > { %3287 = vpow2.f32 %v2040_v40  ;;  %v2038_v42 = vsub.f32 %v2026_v32, %v2033_v41  ;;  %v2779_v40 = vld [vmem:[%s3934_s2 + $0x38] sm:$0xff]  ;;  %v2778_v41 = vld [vmem:[%s3934_s2 + $0x30] sm:$0xff] }
 0xbbf   : > { %v2042_v43 = vmul.f32 1.442695, %v2038_v42  ;;  %v2777_v42 = vld [vmem:[%s3934_s2 + $0x28] sm:$0xff] }
 0xbc0   : > { %v2036_v44 = vpop.xlane.xlu0 %2035 }
 0xbc1   : > { %3289 = vpow2.f32 %v2042_v43  ;;  %v2039_v45 = vsub.f32 %v2027_v36, %v2036_v44  ;;  %v2776_v43 = vld [vmem:[%s3934_s2 + $0x20] sm:$0xff] }
 0xbc3   : > { %v2044_v46 = vmul.f32 1.442695, %v2039_v45 }
 0xbc5   : > { %3291 = vpow2.f32 %v2044_v46 }
 0xbca   : > { %v3288_v47 = vpop.eup %3287 }
 0xbcb   : > { %v2046_v48 = vsel %vm819_vm2, %v3288_v47, 0.0 }
 0xbcc   : > { %2047 = vadd.xlane.f32.xlu1 %v2046_v48 }
 0xbce   : > { %v3290_v49 = vpop.eup %3289 }
 0xbcf   : > { %v2049_v50 = vsel %vm819_vm2, %v3290_v49, 0.0 }
 0xbd0   : > { %2050 = vadd.xlane.f32.xlu0 %v2049_v50 }
 0xbd2   : > { %v3292_v51 = vpop.eup %3291 }
 0xbd3   : > { %v2052_v52 = vsel %vm819_vm2, %v3292_v51, 0.0 }
 0xbd4   : > { %2053 = vadd.xlane.f32.xlu1 %v2052_v52 }
 0xc55   : > { %v2048_v53 = vpop.xlane.xlu1 %2047 }
 0xc56   : > { %3293 = vrcp.f32 %v2048_v53 }
 0xc59   : > { %v2051_v54 = vpop.xlane.xlu0 %2050 }
 0xc5a   : > { %3295 = vrcp.f32 %v2051_v54  ;;  %v2825_v54 = vld [vmem:[%s3936_s4 + $0x18] ss:$0 sm:$0xff] }
 0xc5d   : > { %v2054_v55 = vpop.xlane.xlu1 %2053 }
 0xc5e   : > { %3297 = vrcp.f32 %v2054_v55 }
 0xc63   : > { %v3294_v56 = vpop.eup %3293 }
 0xc64   : > { %v2058_v58 = vmul.f32 %v3294_v56, %v3288_v47  ;;  %v2826_v56 = vld [vmem:[%s3936_s4 + $0x19] ss:$0 sm:$0xff] }
 0xc66   : > { %3162 = vmatmul.mubr.msk.f32.vlgmr.msra.gmra.mxu1 %vm819_vm2, %v2058_v58 }
 0xc67   : > { %v3296_v59 = vpop.eup %3295  ;;  %3170 = vmatpush3.msra.mxu1 %v3755_v8  ;;  %3171 = vmatprep.mubr.msk.f32.mxu1 %vm3320_vm1, %v3319_v23 }
 0xc68   : > { %v2059_v60 = vmul.f32 %v3296_v59, %v3290_v49  ;;  %3191 = vmatprep.subr.mxu1 %v3319_v23 }
 0xc6a   : > { %3167 = vmatmul.mubr.msk.f32.vlgmr.msra.gmra.mxu0 %vm819_vm2, %v2059_v60 }
 0xc6b   : > { %v3298_v3 = vpop.eup %3297  ;;  %3175 = vmatpush3.msra.mxu0 %v2775_v61  ;;  %3182 = vmatprep.mubr.msk.f32.mxu0 %vm3320_vm1, %v3319_v23 }
 0xc6c   : > { %v2060_v4 = vmul.f32 %v3298_v3, %v3292_v51  ;;  %3176 = vmatprep.subr.mxu0 %v3319_v23 }
 0xc6d   : > { %3177 = vmatpush3.msra.mxu0 %v2774_v63 }
 0xc6e   : > { %3172 = vmatmul.mubr.msk.f32.vlgmr.msra.gmra.mxu1 %vm819_vm2, %v2060_v4  ;;  %3178 = vmatprep.subr.mxu0 %v3319_v23 }
 0xc6f   : > { %3179 = vmatpush3.msra.mxu0 %v2773_v5  ;;  %3199 = vmatprep.mubr.msk.f32.mxu1 %vm3320_vm1, %v3319_v23 }
 0xc70   : > { %3180 = vmatprep.subr.mxu0 %v3319_v23  ;;  %3192 = vmatpush3.msra.mxu1 %v2779_v40 }
 0xc71   : > { %3181 = vmatpush3.msra.mxu0 %v2772_v6  ;;  %3193 = vmatprep.subr.mxu1 %v3319_v23 }
 0xc72   : > { %3208 = vmatprep.subr.mxu0 %v3319_v23  ;;  %3194 = vmatpush3.msra.mxu1 %v2778_v41 }
 0xc73   : > { %3195 = vmatprep.subr.mxu1 %v3319_v23 }
 0xc74   : > { %3196 = vmatpush3.msra.mxu1 %v2777_v42 }
 0xc75   : > { %3197 = vmatprep.subr.mxu1 %v3319_v23 }
 0xc76   : > { %3198 = vmatpush3.msra.mxu1 %v2776_v43 }
 0xd26   : > { %v2130_v7 = vpop.f32.mrf.mxu1 }
 0xd27   : > { %3183 = vmatmul.mubr.msk.f32.vlgmr.msra.gmra.mxu0 %vm272_vm0, %v2130_v7 }
 0xd28   : > { %v3163_v8 = vpop.f32.mrf.mxu1  ;;  %3185 = vmatprep.mubr.msk.f32.mxu0 %vm3320_vm1, %v3319_v23 }
 0xd29   : > { %v2787_v8 = vld [vmem:[%s3935_s3 + $0x78] sm:$0xff] }
 0xd2a   : > { %v2203_v9 = vpop.f32.mrf.mxu0  ;;  %3209 = vmatpush3.msra.mxu0 %v2787_v8 }
 0xd2b   : > { %3186 = vmatmul.mubr.msk.f32.gmra.mxu0 %vm272_vm0, %v2203_v9  ;;  %3210 = vmatprep.subr.mxu0 %v3319_v23  ;;  %v2786_v9 = vld [vmem:[%s3935_s3 + $0x70] sm:$0xff] }
 0xd2c   : > { %v3168_v21 = vpop.f32.mrf.mxu0  ;;  %3188 = vmatprep.mubr.msk.f32.mxu0 %vm3320_vm1, %v3319_v23  ;;  %3211 = vmatpush3.msra.mxu0 %v2786_v9 }
 0xd2d   : > { %3212 = vmatprep.subr.mxu0 %v3319_v23  ;;  %v2785_v21 = vld [vmem:[%s3935_s3 + $0x68] sm:$0xff] }
 0xd2e   : > { %v2276_v10 = vpop.f32.mrf.mxu1  ;;  %3213 = vmatpush3.msra.mxu0 %v2785_v21 }
 0xd2f   : > { %3189 = vmatmul.mubr.msk.f32.gmra.mxu0 %vm272_vm0, %v2276_v10  ;;  %3214 = vmatprep.subr.mxu0 %v3319_v23  ;;  %v2784_v10 = vld [vmem:[%s3935_s3 + $0x60] sm:$0xff] }
 0xd30   : > { %v3173_v11 = vpop.f32.mrf.mxu1  ;;  %3224 = vmatprep.mubr.msk.f32.mxu0 %vm3320_vm1, %v3319_v23  ;;  %3215 = vmatpush3.msra.mxu0 %v2784_v10 }
 0xd31   : > { %3216 = vmatprep.subr.mxu0 %v3319_v23  ;;  %v2783_v11 = vld [vmem:[%s3935_s3 + $0x58] sm:$0xff] }
 0xd32   : > { %3217 = vmatpush3.msra.mxu0 %v2783_v11 }
 0xd33   : > { %3218 = vmatprep.subr.mxu0 %v3319_v23 }
 0xde7   : > { %v2359_v13 = vpop.f32.mrf.mxu0 }
 0xde8   : > { %v2360_v14 = vadd.f32 %v2821_v12, %v2359_v13  ;;  %v2781_v13 = vld [vmem:[%s3935_s3 + $0x48] sm:$0xff] }
 0xde9   : > { %v3184_v15 = vpop.f32.mrf.mxu0 }
 0xdea   : > { %v3826_v0 = vadd.f32 %v2360_v14, %v3651_v57  ;;  %v2780_v14 = vld [vmem:[%s3935_s3 + $0x40] sm:$0xff]  ;;  %v2827_v15 = vld [vmem:[%s3936_s4 + $0x16] ss:$0 sm:$0xff] }
 0xdeb   : > { %v2364_v17 = vpop.f32.mrf.mxu0 }
 0xdec   : > { %v2365_v18 = vadd.f32 %v2821_v12, %v2364_v17  ;;  %v2376_v19 = vsel %vm272_vm0, %v3826_v0, 0.0 }
 0xded   : > { %2377 = vadd.xlane.f32.xlu0 %v2376_v19  ;;  %v3187_v20 = vpop.f32.mrf.mxu0 }
 0xdee   : > { %v3831_v22 = vadd.f32 %v2365_v18, %v3656_v62 }
 0xdef   : > { %v2369_v24 = vpop.f32.mrf.mxu0 }
 0xdf0   : > { %v2370_v25 = vadd.f32 %v2821_v12, %v2369_v24  ;;  %v2379_v26 = vsel %vm272_vm0, %v3831_v22, 0.0  ;;  %v2782_v12 = vld [vmem:[%s3935_s3 + $0x50] sm:$0xff] }
 0xdf1   : > { %2380 = vadd.xlane.f32.xlu1 %v2379_v26  ;;  %v3190_v27 = vpop.f32.mrf.mxu0  ;;  %3219 = vmatpush3.msra.mxu0 %v2782_v12 }
 0xdf2   : > { %v3836_v57 = vadd.f32 %v2370_v25, %v3661_v16  ;;  %3220 = vmatprep.subr.mxu0 %v3319_v23 }
 0xdf3   : > { %3221 = vmatpush3.msra.mxu0 %v2781_v13 }
 0xdf4   : > { %v2382_v28 = vsel %vm272_vm0, %v3836_v57, 0.0  ;;  %3222 = vmatprep.subr.mxu0 %v3319_v23 }
 0xdf5   : > { %2383 = vadd.xlane.f32.xlu0 %v2382_v28  ;;  %3223 = vmatpush3.msra.mxu0 %v2780_v14 }
 0xe76   : > { %v2378_v29 = vpop.xlane.xlu0 %2377 }
 0xe77   : > { %v2385_v30 = vmul.f32 0.03125, %v2378_v29 }
 0xe79   : > { %v2388_v2 = vsub.f32 %v3826_v0, %v2385_v30 }
 0xe7a   : > { %v2381_v62 = vpop.xlane.xlu1 %2380 }
 0xe7b   : > { %v2386_v31 = vmul.f32 0.03125, %v2381_v62  ;;  %v2391_v32 = vmul.f32 %v2388_v2, %v2388_v2 }
 0xe7d   : > { %v2389_v33 = vsub.f32 %v3831_v22, %v2386_v31  ;;  %v2394_v34 = vsel %vm272_vm0, %v2391_v32, 0.0 }
 0xe7e   : > { %2395 = vadd.xlane.f32.xlu1 %v2394_v34  ;;  %v2384_v35 = vpop.xlane.xlu0 %2383 }
 0xe7f   : > { %v2387_v36 = vmul.f32 0.03125, %v2384_v35  ;;  %v2392_v16 = vmul.f32 %v2389_v33, %v2389_v33 }
 0xe81   : > { %v2390_v1 = vsub.f32 %v3836_v57, %v2387_v36  ;;  %v2397_v37 = vsel %vm272_vm0, %v2392_v16, 0.0 }
 0xe82   : > { %2398 = vadd.xlane.f32.xlu0 %v2397_v37 }
 0xe83   : > { %v2393_v38 = vmul.f32 %v2390_v1, %v2390_v1 }
 0xe85   : > { %v2400_v39 = vsel %vm272_vm0, %v2393_v38, 0.0 }
 0xe86   : > { %2401 = vadd.xlane.f32.xlu1 %v2400_v39 }
 0xf07   : > { %v2396_v44 = vpop.xlane.xlu1 %2395 }
 0xf08   : > { %v2403_v45 = vmul.f32 0.03125, %v2396_v44 }
 0xf0a   : > { %v2406_v46 = vadd.f32 1e-12, %v2403_v45 }
 0xf0b   : > { %v2399_v47 = vpop.xlane.xlu0 %2398 }
 0xf0c   : > { %3299 = vrsqrt.f32 %v2406_v46  ;;  %v2404_v48 = vmul.f32 0.03125, %v2399_v47 }
 0xf0e   : > { %v2407_v49 = vadd.f32 1e-12, %v2404_v48 }
 0xf0f   : > { %v2402_v50 = vpop.xlane.xlu1 %2401 }
 0xf10   : > { %3301 = vrsqrt.f32 %v2407_v49  ;;  %v2405_v51 = vmul.f32 0.03125, %v2402_v50 }
 0xf12   : > { %v2408_v52 = vadd.f32 1e-12, %v2405_v51 }
 0xf14   : > { %3303 = vrsqrt.f32 %v2408_v52  ;;  %v2831_v52 = vld [vmem:[%s3936_s4 + $0x17] ss:$0 sm:$0xff] }
 0xf19   : > { %v3300_v53 = vpop.eup %3299 }
 0xf1a   : > { %v2412_v55 = vmul.f32 %v3300_v53, %v2388_v2 }
 0xf1c   : > { %v2419_v58 = vmul.f32 %v2825_v54, %v2412_v55 }
 0xf1d   : > { %v3302_v59 = vpop.eup %3301 }
 0xf1e   : > { %v2426_v60 = vadd.f32 %v2826_v56, %v2419_v58  ;;  %v2413_v61 = vmul.f32 %v3302_v59, %v2389_v33 }
 0xf20   : > { %3200 = vmatmul.mubr.msk.f32.vlgmr.msra.gmra.mxu1 %vm272_vm0, %v2426_v60  ;;  %v2420_v63 = vmul.f32 %v2825_v54, %v2413_v61 }
 0xf21   : > { %v3304_v3 = vpop.eup %3303  ;;  %3202 = vmatprep.mubr.msk.f32.mxu1 %vm3320_vm1, %v3319_v23 }
 0xf22   : > { %v2427_v4 = vadd.f32 %v2826_v56, %v2420_v63  ;;  %v2414_v5 = vmul.f32 %v3304_v3, %v2390_v1 }
 0xf24   : > { %3203 = vmatmul.mubr.msk.f32.gmra.mxu1 %vm272_vm0, %v2427_v4  ;;  %v2421_v6 = vmul.f32 %v2825_v54, %v2414_v5 }
 0xf25   : > { %3205 = vmatprep.mubr.msk.f32.mxu1 %vm3320_vm1, %v3319_v23 }
 0xf26   : > { %v2428_v7 = vadd.f32 %v2826_v56, %v2421_v6 }
 0xf28   : > { %3206 = vmatmul.mubr.msk.f32.gmra.mxu1 %vm272_vm0, %v2428_v7 }
 0xfe0   : > { %v2508_v17 = vpop.f32.mrf.mxu1 }
 0xfe1   : > { %v2509_v18 = vadd.f32 %v2827_v15, %v2508_v17 }
 0xfe2   : > { %v3201_v19 = vpop.f32.mrf.mxu1 }
 0xfe3   : > { %v2522_v20 = vmul.f32 %v2509_v18, %v2509_v18 }
 0xfe4   : > { %v2513_v24 = vpop.f32.mrf.mxu1 }
 0xfe5   : > { %v2525_v25 = vmul.f32 %v2522_v20, %v2509_v18  ;;  %v2514_v26 = vadd.f32 %v2827_v15, %v2513_v24 }
 0xfe6   : > { %v3204_v27 = vpop.f32.mrf.mxu1 }
 0xfe7   : > { %v2528_v28 = vmul.f32 0.044715, %v2525_v25  ;;  %v2523_v29 = vmul.f32 %v2514_v26, %v2514_v26 }
 0xfe8   : > { %v2518_v30 = vpop.f32.mrf.mxu1 }
 0xfe9   : > { %v2531_v2 = vadd.f32 %v2528_v28, %v2509_v18  ;;  %v2526_v62 = vmul.f32 %v2523_v29, %v2514_v26  ;;  %v2519_v31 = vadd.f32 %v2827_v15, %v2518_v30 }
 0xfea   : > { %v3207_v32 = vpop.f32.mrf.mxu1 }
 0xfeb   : > { %v2534_v33 = vmul.f32 0.7978846, %v2531_v2  ;;  %v2529_v34 = vmul.f32 0.044715, %v2526_v62  ;;  %v2524_v35 = vmul.f32 %v2519_v31, %v2519_v31 }
 0xfed   : > { %3305 = vtanh.f32 %v2534_v33  ;;  %v2532_v36 = vadd.f32 %v2529_v34, %v2514_v26  ;;  %v2527_v16 = vmul.f32 %v2524_v35, %v2519_v31 }
 0xfef   : > { %v2535_v1 = vmul.f32 0.7978846, %v2532_v36  ;;  %v2530_v37 = vmul.f32 0.044715, %v2527_v16 }
 0xff1   : > { %3307 = vtanh.f32 %v2535_v1  ;;  %v2533_v38 = vadd.f32 %v2530_v37, %v2519_v31 }
 0xff3   : > { %v2536_v39 = vmul.f32 0.7978846, %v2533_v38 }
 0xff5   : > { %3309 = vtanh.f32 %v2536_v39 }
 0xffa   : > { %v3306_v40 = vpop.eup %3305 }
 0xffb   : > { %v2540_v41 = vadd.f32 1.0, %v3306_v40 }
 0xffd   : > { %v2543_v42 = vmul.f32 0.5, %v2540_v41 }
 0xffe   : > { %v3308_v43 = vpop.eup %3307 }
 0xfff   : > { %v2546_v44 = vmul.f32 %v2543_v42, %v2509_v18  ;;  %v2541_v45 = vadd.f32 1.0, %v3308_v43 }
0x1001   : > { %3225 = vmatmul.mubr.msk.f32.vlgmr.msra.gmra.mxu0 %vm1345_vm3, %v2546_v44  ;;  %v2544_v46 = vmul.f32 0.5, %v2541_v45 }
0x1002   : > { %v3310_v47 = vpop.eup %3309  ;;  %3227 = vmatprep.mubr.msk.f32.mxu0 %vm3320_vm1, %v3319_v23 }
0x1003   : > { %v2547_v48 = vmul.f32 %v2544_v46, %v2514_v26  ;;  %v2542_v49 = vadd.f32 1.0, %v3310_v47 }
0x1005   : > { %3228 = vmatmul.mubr.msk.f32.gmra.mxu0 %vm1345_vm3, %v2547_v48  ;;  %v2545_v50 = vmul.f32 0.5, %v2542_v49 }
0x1006   : > { %3230 = vmatprep.mubr.msk.f32.mxu0 %vm3320_vm1, %v3319_v23 }
0x1007   : > { %v2548_v51 = vmul.f32 %v2545_v50, %v2519_v31 }
0x1009   : > { %3231 = vmatmul.mubr.msk.f32.gmra.mxu0 %vm1345_vm3, %v2548_v51 }
0x10c1   : > { %v2628_v53 = vpop.f32.mrf.mxu0 }
0x10c2   : > { %v2629_v54 = vadd.f32 %v2831_v52, %v2628_v53 }
0x10c3   : > { %v3226_v55 = vpop.f32.mrf.mxu0 }
0x10c4   : > { %v2642_v56 = vadd.f32 %v2629_v54, %v3826_v0 }
0x10c5   : > { %v2633_v58 = vpop.f32.mrf.mxu0 }
0x10c6   : > { %2645 = vst.msk [vmem:[%s226_s25] sm:$0xff] %vm272_vm0, %v2642_v56  ;;  %v2634_v23 = vadd.f32 %v2831_v52, %v2633_v58 }
0x10c7   : > { %v3229_v59 = vpop.f32.mrf.mxu0 }
0x10c8   : > { %v2643_v60 = vadd.f32 %v2634_v23, %v3831_v22 }
0x10c9   : > { %v2638_v61 = vpop.f32.mrf.mxu0 }
0x10ca   : > { %2646 = vst.msk [vmem:[%s226_s25 + $0x8] sm:$0xff] %vm272_vm0, %v2643_v60  ;;  %v2639_v63 = vadd.f32 %v2831_v52, %v2638_v61 }
0x10cb   : > { %v3232_v3 = vpop.f32.mrf.mxu0 }
0x10cc   : > { %v2644_v4 = vadd.f32 %v2639_v63, %v3836_v57 }
0x10ce   : > { %2647 = vst.msk [vmem:[%s226_s25 + $0x10] sm:$0xff] %vm272_vm0, %v2644_v4 }
0x10cf PF: > { %s15_s18 = sadd.s32 1, %s3317_s18  }
0x10d0   : > { %p12_p4 = scmp.ge.s32.totalorder %s15_s18, 4  }
0x10d2   :  { %14 = sbr.rel (!%p12_p4) target bundleno = 1 (0x1), region = 80 }

</bundles_post_ra>
